<compile_context>
chip_gen: v7x
topology: tpu7x:2x2x1
jax: 0.10.0
libtpu: 0.0.40
codegen_flags: <defaults>
</compile_context>

<pallas_src>
from functools import partial

import numpy as np

import jax
import jax.numpy as jnp
from jax import lax
from jax.experimental import pallas as pl
from jax.experimental.pallas import tpu as pltpu

BN_EPS = 1e-5

# Geometry implied by Linear(288 = 32*3*3): input spatial size is 12x12.
H_PAD = 16          # 12 + 2*2 zero padding = rows per image in the 2-D layout
K1 = 256            # layer-1 matmul depth: 5 kh taps * 48 lanes, padded 240 -> 256
L1 = 256            # layer-1 output lanes: 16 col slots * 16 out-channels
L2 = 256            # lanes per kh block, layer 2:  8 col slots * 32 out-channels
LFC = 128           # lanes per pooled-row block of the FC matmul output (A padded to 128)
B_BLOCK_MAX = 32    # images per grid step (sweep 32-64 on v6e; 32 fits 32 MiB VMEM everywhere)
MXU_DTYPE = jnp.bfloat16   # native MXU input type on v5e/v6e/v7x (f32 accumulation kept)


# ----------------------------------------------------------------------------- kernel

def _rows_ahead(x, k):
    """y[p, :] == x[(p + k) % nrows, :]   (k may be negative; np.roll semantics)."""
    n = x.shape[0]
    k = k % n
    if k == 0:
        return x
    return pltpu.roll(x, shift=n - k, axis=0)


def _lanes_ahead(x, k):
    """y[:, l] == x[:, (l + k) % nlanes]."""
    n = x.shape[1]
    k = k % n
    if k == 0:
        return x
    return pltpu.roll(x, shift=n - k, axis=1)


def _fused_qmodel_kernel(xp5_ref, t1_ref, b1_ref, t2_ref, b2_ref, wfc_ref, bfc_ref,
                         o_ref):
    """Whole QModelCNN forward for one block of images (all buffers VMEM-resident).

    xp5_ref: (b_blk*16, 256) bf16  5-tap packed padded input rows;
                                   lane = kh*48 + iw*3 + cin (240..255 zero)
    t1_ref : (256, 256)      bf16  layer-1 Toeplitz weights (BN folded);
                                   out lane = ow1*16 + cout
    b1_ref : (1, 256)        f32   folded conv1+BN bias (lanes for ow1>=12 zeroed)
    t2_ref : (256, 5*256)    bf16  layer-2 Toeplitz weights vs pooled layer-1 lanes
    b2_ref : (1, 256)        f32   folded conv2+BN bias (lanes for ow2>=6 zeroed)
    wfc_ref: (256, 3*128)    bf16  FC weights pre-permuted to pooled layer-2 layout
    bfc_ref: (1, 128)        f32   FC bias, zero-padded to 128 lanes
    o_ref  : (b_blk*16, 128) f32   row b*16 holds image b's Q-values (lane-dense store)
    """
    f32 = jnp.float32

    # ---- layer 1: conv5x5(pad=2) + BN + ReLU -- ONE K=256 matmul, no rolls --------
    z1 = jnp.dot(xp5_ref[...], t1_ref[...], preferred_element_type=f32)
    h1 = jnp.maximum(z1 + b1_ref[...], 0.0)      # row b*16+oh1, lane ow1*16+c

    # ---- maxpool 2x2 (rows: adjacent sublanes; cols: 16-lane blocks) --------------
    p1 = jnp.maximum(h1, _rows_ahead(h1, 1))
    p1 = jnp.maximum(p1, _lanes_ahead(p1, 16))
    # Valid pooled rows are b*16 + {0,2,...,10}.  Zero everything else so the
    # (circularly rolled) out-of-range taps of layer 2 contribute exactly 0.
    R = p1.shape[0]
    row = lax.broadcasted_iota(jnp.int32, (R, 1), 0)
    valid = ((row & 15) < 12) & ((row & 1) == 0)
    p1 = jnp.where(valid, p1, 0.0)

    # ---- layer 2: conv5x5(pad=2) + BN + ReLU --------------------------------------
    # Pooled rows sit 2 sublanes apart, so kh taps are row shifts of 2*kh - 4.
    # Slice BEFORE rolling: 256-lane rolls instead of the full 1280-lane z2.
    z2 = jnp.dot(p1.astype(t2_ref.dtype), t2_ref[...], preferred_element_type=f32)
    c2 = _rows_ahead(z2[:, 0:L2], -4)
    for kh in range(1, 5):
        c2 = c2 + _rows_ahead(z2[:, kh * L2:(kh + 1) * L2], 2 * kh - 4)
    h2 = jnp.maximum(c2 + b2_ref[...], 0.0)      # row b*16+2*oh2, lane ow2*32+c

    # ---- maxpool 2x2 ----------------------------------------------------------------
    p2 = jnp.maximum(h2, _rows_ahead(h2, 2))
    p2 = jnp.maximum(p2, _lanes_ahead(p2, 32))   # pooled: rows b*16+{0,4,8},
                                                 #         lane blocks {0,64,128}

    # ---- flatten (NCHW order baked into wfc) + Linear (slice-before-roll) ----------
    zo = jnp.dot(p2.astype(wfc_ref.dtype), wfc_ref[...], preferred_element_type=f32)
    out = (zo[:, 0:LFC]
           + _rows_ahead(zo[:, LFC:2 * LFC], 4)
           + _rows_ahead(zo[:, 2 * LFC:3 * LFC], 8))
    # Lane-dense, unmasked (rows, 128) store; wrapper slices rows [::16, :A].
    o_ref[...] = out + bfc_ref[...]


# ----------------------------------------------------------------------------- weight prep

def prepare_params(params):
    """Fold BN and repack all weights into the kernel's 2-D layouts (bf16 for MXU).
    Run ONCE (outside the per-step forward path)."""
    f32 = jnp.float32

    # ----- layer 1: K=240(->256) Toeplitz; row = kh*48 + iw*3 + ci, col = ow1*16 + co
    s1 = params["g1"] * lax.rsqrt(params["v1"] + BN_EPS)
    w1s = params["w1"].astype(f32) * s1[:, None, None, None]       # (16,3,5,5) [co,ci,kh,kw]
    sel1 = np.zeros((5, 16, 16), np.float32)                       # [kw, iw_pad, ow1]
    for kw in range(5):
        for ow in range(12):
            sel1[kw, ow + kw, ow] = 1.0
    t1 = jnp.einsum("kio,Ocnk->nicoO", jnp.asarray(sel1), w1s).reshape(240, L1)
    t1 = jnp.pad(t1, ((0, K1 - 240), (0, 0)))                      # (256, 256)
    b1 = (params["b1"] - params["m1"]) * s1 + params["be1"]
    ow1_valid = jnp.asarray((np.arange(16) < 12).astype(np.float32))
    b1row = (jnp.tile(b1, 16).reshape(16, 16) * ow1_valid[:, None]).reshape(1, L1).astype(f32)

    # ----- layer 2: Toeplitz weight against the pooled layer-1 lane layout -----------
    s2 = params["g2"] * lax.rsqrt(params["v2"] + BN_EPS)
    w2s = params["w2"].astype(f32) * s2[:, None, None, None]       # (32,16,5,5)
    sel2 = np.zeros((5, 16, 8), np.float32)                        # [kw, ow1 slot, ow2]
    for kw in range(5):
        for ow2 in range(6):
            xw = ow2 + kw - 2                                      # pooled-col tap
            if 0 <= xw <= 5:
                sel2[kw, 2 * xw, ow2] = 1.0                        # pooled col xw lives at
                                                                   # lane block 2*xw
    t2 = jnp.einsum("kmu,Ocnk->mcnuO", jnp.asarray(sel2), w2s).reshape(256, 5 * L2)
    b2 = (params["b2"] - params["m2"]) * s2 + params["be2"]
    ow2_valid = jnp.asarray((np.arange(8) < 6).astype(np.float32))
    b2row = (jnp.tile(b2, 8).reshape(8, 32) * ow2_valid[:, None]).reshape(1, L2).astype(f32)

    # ----- FC: permute columns to the pooled layer-2 layout (NCHW flatten baked in) ---
    A = params["bfc"].shape[0]
    assert A <= LFC, "FC packing assumes action_size <= 128"
    wfc_r = params["wfc"].astype(f32).reshape(A, 32, 3, 3)         # [a, co, oh, ow]
    w = jnp.zeros((8, 32, 3, LFC), f32)                            # [ow2 slot, co, oh, a]
    for ow in range(3):
        w = w.at[2 * ow, :, :, :A].set(jnp.transpose(wfc_r[:, :, :, ow], (1, 2, 0)))
    wfc = w.reshape(256, 3 * LFC)
    bfc = jnp.zeros((1, LFC), f32).at[0, :A].set(params["bfc"].astype(f32))

    return {"t1": t1.astype(MXU_DTYPE), "b1": b1row,
            "t2": t2.astype(MXU_DTYPE), "b2": b2row,
            "wfc": wfc.astype(MXU_DTYPE), "bfc": bfc}


# ----------------------------------------------------------------------------- forward

@partial(jax.jit, static_argnames=("action_size",))
def qmodel_forward(x_nchw, prep, *, action_size):
    """x_nchw: (B, 3, 12, 12) float32 (PyTorch layout).  Returns (B, action_size)."""
    B = x_nchw.shape[0]
    # Cap b_blk at ceil(B/2) so the "parallel" grid axis has >=2 blocks (v7x has 2 TCs).
    b_blk = 1 if B <= 1 else min(B_BLOCK_MAX, (B + 1) // 2)
    n_blk = -(-B // b_blk)
    b_pad = n_blk * b_blk

    # Layout glue on the *raw* input only: NCHW -> NHWC -> zero-pad -> pack the 5 kh
    # taps along lanes (row p, lane kh*48 + iw*3 + ci == padded row p+kh).  No im2col
    # over kw; ~15 KiB/img.  Cast to bf16 for the MXU (f32 accumulation in-kernel).
    x = jnp.transpose(x_nchw, (0, 2, 3, 1)).astype(jnp.float32)
    x = jnp.pad(x, ((0, b_pad - B), (2, 2), (2, 2), (0, 0)))        # (b_pad,16,16,3)
    xr = jnp.pad(x.reshape(b_pad, H_PAD, 48), ((0, 0), (0, 4), (0, 0)))
    xp5 = jnp.concatenate([xr[:, kh:kh + H_PAD, :] for kh in range(5)], axis=-1)
    xp5 = jnp.pad(xp5, ((0, 0), (0, 0), (0, K1 - 240)))             # lanes 240 -> 256
    xp5 = xp5.reshape(b_pad * H_PAD, K1).astype(MXU_DTYPE)

    rows = b_blk * H_PAD
    out_full = pl.pallas_call(
        _fused_qmodel_kernel,
        out_shape=jax.ShapeDtypeStruct((b_pad * H_PAD, LFC), jnp.float32),
        grid=(n_blk,),
        in_specs=[
            pl.BlockSpec((rows, K1), lambda i: (i, 0)),
            pl.BlockSpec((K1, L1), lambda i: (0, 0)),
            pl.BlockSpec((1, L1), lambda i: (0, 0)),
            pl.BlockSpec((256, 5 * L2), lambda i: (0, 0)),
            pl.BlockSpec((1, L2), lambda i: (0, 0)),
            pl.BlockSpec((256, 3 * LFC), lambda i: (0, 0)),
            pl.BlockSpec((1, LFC), lambda i: (0, 0)),
        ],
        out_specs=pl.BlockSpec((rows, LFC), lambda i: (i, 0)),
        compiler_params=pltpu.CompilerParams(
            dimension_semantics=("parallel",),        # shard batch blocks across TCs
            vmem_limit_bytes=32 * 1024 * 1024),       # fits v7x scoped; raises v5e default
    )(xp5, prep["t1"], prep["b1"], prep["t2"], prep["b2"], prep["wfc"], prep["bfc"])

    # Each image's Q-values sit at row b*16 of the lane-dense output slab.
    return out_full[0::H_PAD, :action_size][:B]


# ----------------------------------------------------------------------------- reference

def qmodel_reference(x_nchw, params):
    """Pure-JAX (XLA) reference mirroring the PyTorch forward, for validation."""
    def layer(x, w, b, g, be, m, v):
        y = lax.conv_general_dilated(
            x, w, window_strides=(1, 1), padding=[(2, 2), (2, 2)],
            dimension_numbers=("NCHW", "OIHW", "NCHW"))
        y = y + b[None, :, None, None]
        y = (y - m[None, :, None, None]) / jnp.sqrt(v[None, :, None, None] + BN_EPS)
        y = y * g[None, :, None, None] + be[None, :, None, None]
        y = jnp.maximum(y, 0.0)
        y = lax.reduce_window(y, -jnp.inf, lax.max, (1, 1, 2, 2), (1, 1, 2, 2), "VALID")
        return y

    h1 = layer(x_nchw, params["w1"], params["b1"],
               params["g1"], params["be1"], params["m1"], params["v1"])
    h2 = layer(h1, params["w2"], params["b2"],
               params["g2"], params["be2"], params["m2"], params["v2"])
    feat = h2.reshape(h2.shape[0], -1)
    return feat @ params["wfc"].T + params["bfc"]


# ----------------------------------------------------------------------------- main

def make_params(key, action_size=4):
    ks = jax.random.split(key, 14)
    f32 = jnp.float32
    return {
        "w1": 0.1 * jax.random.normal(ks[0], (16, 3, 5, 5), f32),
        "b1": 0.1 * jax.random.normal(ks[1], (16,), f32),
        "g1": 1.0 + 0.1 * jax.random.normal(ks[2], (16,), f32),
        "be1": 0.1 * jax.random.normal(ks[3], (16,), f32),
        "m1": 0.1 * jax.random.normal(ks[4], (16,), f32),
        "v1": 1.0 + 0.5 * jax.random.uniform(ks[5], (16,), f32),
        "w2": 0.05 * jax.random.normal(ks[6], (32, 16, 5, 5), f32),
        "b2": 0.1 * jax.random.normal(ks[7], (32,), f32),
        "g2": 1.0 + 0.1 * jax.random.normal(ks[8], (32,), f32),
        "be2": 0.1 * jax.random.normal(ks[9], (32,), f32),
        "m2": 0.1 * jax.random.normal(ks[10], (32,), f32),
        "v2": 1.0 + 0.5 * jax.random.uniform(ks[11], (32,), f32),
        "wfc": 0.05 * jax.random.normal(ks[12], (action_size, 288), f32),
        "bfc": 0.1 * jax.random.normal(ks[13], (action_size,), f32),
    }


if __name__ == "__main__":
    key = jax.random.PRNGKey(0)
    k_params, k_x = jax.random.split(key)

    action_size = 4
    params = make_params(k_params, action_size)

    # Linear(288) with 32 channels after layer2 => spatial 3x3 => input 12x12.
    x = jax.random.normal(k_x, (2, 3, 12, 12), jnp.float32)   # NCHW like PyTorch

    prep = prepare_params(params)     # one-time weight repack (not per-step)
    out = jax.block_until_ready(qmodel_forward(x, prep, action_size=action_size))

    ref = qmodel_reference(x, params)
    assert out.shape == (2, action_size), out.shape
    # Kernel feeds the MXU bf16 inputs (f32 accumulation), per the perf review, so the
    # comparison vs the f32 XLA reference carries bf16 input-rounding error (~unit
    # roundoff 2^-8 propagated through 3 matmuls) -> 2e-2 tolerance.
    assert jnp.allclose(out, ref, rtol=2e-2, atol=2e-2), (
        "mismatch vs reference:\n%s\n%s" % (out, ref))

    print("KERNEL_OK")
</pallas_src>

<mosaic_0001>
module attributes {stable_mosaic.version = 11 : i64} {
  func.func @_fused_qmodel_kernel(%arg0: i32, %arg1: memref<16x256xbf16, #tpu.memory_space<vmem>>, %arg2: memref<256x256xbf16, #tpu.memory_space<vmem>>, %arg3: memref<1x256xf32, #tpu.memory_space<vmem>>, %arg4: memref<256x1280xbf16, #tpu.memory_space<vmem>>, %arg5: memref<1x256xf32, #tpu.memory_space<vmem>>, %arg6: memref<256x384xbf16, #tpu.memory_space<vmem>>, %arg7: memref<1x128xf32, #tpu.memory_space<vmem>>, %arg8: memref<16x128xf32, #tpu.memory_space<vmem>>) attributes {dimension_semantics = [#tpu.dimension_semantics<parallel>], iteration_bounds = array<i64: 2>, scalar_prefetch = 0 : i64, scratch_operands = 0 : i64, tpu.core_type = #tpu.core_type<tc>, window_params = [{transform_indices = @transform_0, window_bounds = array<i64: 16, 256>}, {pipeline_mode = #tpu.pipeline_mode<synchronous>, transform_indices = @transform_1, window_bounds = array<i64: 256, 256>}, {pipeline_mode = #tpu.pipeline_mode<synchronous>, transform_indices = @transform_2, window_bounds = array<i64: 1, 256>}, {pipeline_mode = #tpu.pipeline_mode<synchronous>, transform_indices = @transform_3, window_bounds = array<i64: 256, 1280>}, {pipeline_mode = #tpu.pipeline_mode<synchronous>, transform_indices = @transform_4, window_bounds = array<i64: 1, 256>}, {pipeline_mode = #tpu.pipeline_mode<synchronous>, transform_indices = @transform_5, window_bounds = array<i64: 256, 384>}, {pipeline_mode = #tpu.pipeline_mode<synchronous>, transform_indices = @transform_6, window_bounds = array<i64: 1, 128>}, {transform_indices = @transform_7, window_bounds = array<i64: 16, 128>}]} {
    %c0 = arith.constant 0 : index
    %c0_0 = arith.constant 0 : index
    %0 = vector.load %arg1[%c0, %c0_0] : memref<16x256xbf16, #tpu.memory_space<vmem>>, vector<16x256xbf16>
    %c0_1 = arith.constant 0 : index
    %c0_2 = arith.constant 0 : index
    %1 = vector.load %arg2[%c0_1, %c0_2] : memref<256x256xbf16, #tpu.memory_space<vmem>>, vector<256x256xbf16>
    %cst = arith.constant dense<0.000000e+00> : vector<16x256xf32>
    %2 = tpu.matmul %0, %1, %cst {dimension_numbers = #tpu.dot_dimension_numbers<[1], [0], [0], [1], [0, 0, 1, 1], [], []>} : vector<16x256xbf16>, vector<256x256xbf16>, vector<16x256xf32> -> vector<16x256xf32>
    %c0_3 = arith.constant 0 : index
    %c0_4 = arith.constant 0 : index
    %3 = vector.load %arg3[%c0_3, %c0_4] : memref<1x256xf32, #tpu.memory_space<vmem>>, vector<1x256xf32>
    %4 = vector.broadcast %3 : vector<1x256xf32> to vector<16x256xf32>
    %5 = arith.addf %2, %4 : vector<16x256xf32>
    %cst_5 = arith.constant 0.000000e+00 : f32
    %6 = vector.broadcast %cst_5 : f32 to vector<16x256xf32>
    %7 = arith.maximumf %5, %6 : vector<16x256xf32>
    %c15_i32 = arith.constant 15 : i32
    %8 = tpu.dynamic_rotate %7 by %c15_i32 dim 0 : vector<16x256xf32>, i32 -> vector<16x256xf32>
    %9 = arith.maximumf %7, %8 : vector<16x256xf32>
    %c240_i32 = arith.constant 240 : i32
    %10 = tpu.dynamic_rotate %9 by %c240_i32 dim 1 : vector<16x256xf32>, i32 -> vector<16x256xf32>
    %11 = arith.maximumf %9, %10 : vector<16x256xf32>
    %12 = tpu.iota {dimensions = array<i32: 0>} : vector<16x1xi32>
    %c15_i32_6 = arith.constant 15 : i32
    %13 = vector.broadcast %c15_i32_6 : i32 to vector<16x1xi32>
    %14 = arith.andi %12, %13 : vector<16x1xi32>
    %c12_i32 = arith.constant 12 : i32
    %15 = vector.broadcast %c12_i32 : i32 to vector<16x1xi32>
    %16 = arith.cmpi slt, %14, %15 : vector<16x1xi32>
    %c1_i32 = arith.constant 1 : i32
    %17 = vector.broadcast %c1_i32 : i32 to vector<16x1xi32>
    %18 = arith.andi %12, %17 : vector<16x1xi32>
    %c0_i32 = arith.constant 0 : i32
    %19 = vector.broadcast %c0_i32 : i32 to vector<16x1xi32>
    %20 = arith.cmpi eq, %18, %19 : vector<16x1xi32>
    %21 = arith.andi %16, %20 : vector<16x1xi1>
    %cst_7 = arith.constant 0.000000e+00 : f32
    %22 = vector.shape_cast %21 : vector<16x1xi1> to vector<16x1xi1>
    %23 = vector.broadcast %22 : vector<16x1xi1> to vector<16x256xi1>
    %24 = vector.broadcast %cst_7 : f32 to vector<16x256xf32>
    %25 = arith.select %23, %11, %24 : vector<16x256xi1>, vector<16x256xf32>
    %26 = arith.truncf %25 : vector<16x256xf32> to vector<16x256xbf16>
    %c0_8 = arith.constant 0 : index
    %c0_9 = arith.constant 0 : index
    %27 = vector.load %arg4[%c0_8, %c0_9] : memref<256x1280xbf16, #tpu.memory_space<vmem>>, vector<256x1280xbf16>
    %cst_10 = arith.constant dense<0.000000e+00> : vector<16x1280xf32>
    %28 = tpu.matmul %26, %27, %cst_10 {dimension_numbers = #tpu.dot_dimension_numbers<[1], [0], [0], [1], [0, 0, 1, 1], [], []>} : vector<16x256xbf16>, vector<256x1280xbf16>, vector<16x1280xf32> -> vector<16x1280xf32>
    %29 = vector.extract_strided_slice %28 {offsets = [0, 0], sizes = [16, 256], strides = [1, 1]} : vector<16x1280xf32> to vector<16x256xf32>
    %c4_i32 = arith.constant 4 : i32
    %30 = tpu.dynamic_rotate %29 by %c4_i32 dim 0 : vector<16x256xf32>, i32 -> vector<16x256xf32>
    %31 = vector.extract_strided_slice %28 {offsets = [0, 256], sizes = [16, 256], strides = [1, 1]} : vector<16x1280xf32> to vector<16x256xf32>
    %c2_i32 = arith.constant 2 : i32
    %32 = tpu.dynamic_rotate %31 by %c2_i32 dim 0 : vector<16x256xf32>, i32 -> vector<16x256xf32>
    %33 = arith.addf %30, %32 : vector<16x256xf32>
    %34 = vector.extract_strided_slice %28 {offsets = [0, 512], sizes = [16, 256], strides = [1, 1]} : vector<16x1280xf32> to vector<16x256xf32>
    %35 = arith.addf %33, %34 : vector<16x256xf32>
    %36 = vector.extract_strided_slice %28 {offsets = [0, 768], sizes = [16, 256], strides = [1, 1]} : vector<16x1280xf32> to vector<16x256xf32>
    %c14_i32 = arith.constant 14 : i32
    %37 = tpu.dynamic_rotate %36 by %c14_i32 dim 0 : vector<16x256xf32>, i32 -> vector<16x256xf32>
    %38 = arith.addf %35, %37 : vector<16x256xf32>
    %39 = vector.extract_strided_slice %28 {offsets = [0, 1024], sizes = [16, 256], strides = [1, 1]} : vector<16x1280xf32> to vector<16x256xf32>
    %c12_i32_11 = arith.constant 12 : i32
    %40 = tpu.dynamic_rotate %39 by %c12_i32_11 dim 0 : vector<16x256xf32>, i32 -> vector<16x256xf32>
    %41 = arith.addf %38, %40 : vector<16x256xf32>
    %c0_12 = arith.constant 0 : index
    %c0_13 = arith.constant 0 : index
    %42 = vector.load %arg5[%c0_12, %c0_13] : memref<1x256xf32, #tpu.memory_space<vmem>>, vector<1x256xf32>
    %43 = vector.broadcast %42 : vector<1x256xf32> to vector<16x256xf32>
    %44 = arith.addf %41, %43 : vector<16x256xf32>
    %cst_14 = arith.constant 0.000000e+00 : f32
    %45 = vector.broadcast %cst_14 : f32 to vector<16x256xf32>
    %46 = arith.maximumf %44, %45 : vector<16x256xf32>
    %c14_i32_15 = arith.constant 14 : i32
    %47 = tpu.dynamic_rotate %46 by %c14_i32_15 dim 0 : vector<16x256xf32>, i32 -> vector<16x256xf32>
    %48 = arith.maximumf %46, %47 : vector<16x256xf32>
    %c224_i32 = arith.constant 224 : i32
    %49 = tpu.dynamic_rotate %48 by %c224_i32 dim 1 : vector<16x256xf32>, i32 -> vector<16x256xf32>
    %50 = arith.maximumf %48, %49 : vector<16x256xf32>
    %51 = arith.truncf %50 : vector<16x256xf32> to vector<16x256xbf16>
    %c0_16 = arith.constant 0 : index
    %c0_17 = arith.constant 0 : index
    %52 = vector.load %arg6[%c0_16, %c0_17] : memref<256x384xbf16, #tpu.memory_space<vmem>>, vector<256x384xbf16>
    %cst_18 = arith.constant dense<0.000000e+00> : vector<16x384xf32>
    %53 = tpu.matmul %51, %52, %cst_18 {dimension_numbers = #tpu.dot_dimension_numbers<[1], [0], [0], [1], [0, 0, 1, 1], [], []>} : vector<16x256xbf16>, vector<256x384xbf16>, vector<16x384xf32> -> vector<16x384xf32>
    %54 = vector.extract_strided_slice %53 {offsets = [0, 0], sizes = [16, 128], strides = [1, 1]} : vector<16x384xf32> to vector<16x128xf32>
    %55 = vector.extract_strided_slice %53 {offsets = [0, 128], sizes = [16, 128], strides = [1, 1]} : vector<16x384xf32> to vector<16x128xf32>
    %c12_i32_19 = arith.constant 12 : i32
    %56 = tpu.dynamic_rotate %55 by %c12_i32_19 dim 0 : vector<16x128xf32>, i32 -> vector<16x128xf32>
    %57 = arith.addf %54, %56 : vector<16x128xf32>
    %58 = vector.extract_strided_slice %53 {offsets = [0, 256], sizes = [16, 128], strides = [1, 1]} : vector<16x384xf32> to vector<16x128xf32>
    %c8_i32 = arith.constant 8 : i32
    %59 = tpu.dynamic_rotate %58 by %c8_i32 dim 0 : vector<16x128xf32>, i32 -> vector<16x128xf32>
    %60 = arith.addf %57, %59 : vector<16x128xf32>
    %c0_20 = arith.constant 0 : index
    %c0_21 = arith.constant 0 : index
    %61 = vector.load %arg7[%c0_20, %c0_21] : memref<1x128xf32, #tpu.memory_space<vmem>>, vector<1x128xf32>
    %62 = vector.broadcast %61 : vector<1x128xf32> to vector<16x128xf32>
    %63 = arith.addf %60, %62 : vector<16x128xf32>
    %c0_22 = arith.constant 0 : index
    %c0_23 = arith.constant 0 : index
    %64 = vector.load %arg8[%c0_22, %c0_23] : memref<16x128xf32, #tpu.memory_space<vmem>>, vector<16x128xf32>
    tpu.vector_store %arg8[%c0_22, %c0_23], %63 {strides = array<i32>} : memref<16x128xf32, #tpu.memory_space<vmem>>, vector<16x128xf32>,
    return
  }
  func.func @transform_0(%arg0: i32) -> (i32, i32) {
    %c0_i32 = arith.constant 0 : i32
    %c0_i32_0 = arith.constant 0 : i32
    return %arg0, %c0_i32 : i32, i32
  }
  func.func @transform_1(%arg0: i32) -> (i32, i32) {
    %c0_i32 = arith.constant 0 : i32
    %c0_i32_0 = arith.constant 0 : i32
    %c0_i32_1 = arith.constant 0 : i32
    return %c0_i32, %c0_i32_0 : i32, i32
  }
  func.func @transform_2(%arg0: i32) -> (i32, i32) {
    %c0_i32 = arith.constant 0 : i32
    %c0_i32_0 = arith.constant 0 : i32
    %c0_i32_1 = arith.constant 0 : i32
    return %c0_i32, %c0_i32_0 : i32, i32
  }
  func.func @transform_3(%arg0: i32) -> (i32, i32) {
    %c0_i32 = arith.constant 0 : i32
    %c0_i32_0 = arith.constant 0 : i32
    %c0_i32_1 = arith.constant 0 : i32
    return %c0_i32, %c0_i32_0 : i32, i32
  }
  func.func @transform_4(%arg0: i32) -> (i32, i32) {
    %c0_i32 = arith.constant 0 : i32
    %c0_i32_0 = arith.constant 0 : i32
    %c0_i32_1 = arith.constant 0 : i32
    return %c0_i32, %c0_i32_0 : i32, i32
  }
  func.func @transform_5(%arg0: i32) -> (i32, i32) {
    %c0_i32 = arith.constant 0 : i32
    %c0_i32_0 = arith.constant 0 : i32
    %c0_i32_1 = arith.constant 0 : i32
    return %c0_i32, %c0_i32_0 : i32, i32
  }
  func.func @transform_6(%arg0: i32) -> (i32, i32) {
    %c0_i32 = arith.constant 0 : i32
    %c0_i32_0 = arith.constant 0 : i32
    %c0_i32_1 = arith.constant 0 : i32
    return %c0_i32, %c0_i32_0 : i32, i32
  }
  func.func @transform_7(%arg0: i32) -> (i32, i32) {
    %c0_i32 = arith.constant 0 : i32
    %c0_i32_0 = arith.constant 0 : i32
    return %arg0, %c0_i32 : i32, i32
  }
}

</mosaic_0001>

<bundles_post_ra>
// kernel: qmodel_forward.1
= control target key start
LH: loop header
LB: loop body
LE: loop exit
PB: predicated region body
PF: predicated region fallthrough
CT: control target
= control target key end

     0   :  { %12 = vsyncpa [#allocation3], 0  ;;  %s3180_s24 = smov 0   ;;  %s3635_s0 = inlined_call_operand.vmem [shape: bf16[32,256], index: 0, kind: input, shape index: {}]   ;;  %s3636_s1 = inlined_call_operand.vmem [shape: bf16[256,256], index: 1, kind: input, shape index: {}]   ;;  %s3637_s2 = inlined_call_operand.vmem [shape: f32[1,256], index: 2, kind: input, shape index: {}]   ;;  %s3638_s3 = inlined_call_operand.hbm [shape: bf16[256,1280], index: 3, kind: input, shape index: {}]   ;;  %s3639_s4 = inlined_call_operand.vmem [shape: f32[1,256], index: 4, kind: input, shape index: {}]   ;;  %s3640_s5 = inlined_call_operand.vmem [shape: bf16[256,384], index: 5, kind: input, shape index: {}]   ;;  %s3641_s6 = inlined_call_operand.vmem [shape: f32[1,128], index: 6, kind: input, shape index: {}]   ;;  %s3642_s7 = inlined_call_operand.vmem [shape: f32[32,128], index: 7, kind: output, shape index: {}]  }
   0x1 LB: > { %s2387_s25 = sadd.s32 4294967295, %s3133_s24   ;;  %p2389_p0 = scmp.ge.s32.totalorder %s3133_s24, 1  ;;  %s3133_s24 = sphi %s3180_s24, %s18_s24  }
   0x2   : > { %p201_p1 = scmp.lt.s32.totalorder %s3133_s24, 3  ;;  %s3135_s26 = smov [#allocation2]  }
   0x3   : > { %s219_s27 = sshll.u32 %s3135_s26, 4  ;;  %p3194_p3 = scmp.eq.s32.totalorder %s2387_s25, 0  ;;  %s220_s27 = int_to_ptr.vmem [resolvable:$true] %s219_s27 }
   0x4   : > { %p3188_p2 = pnand %p2389_p0, %p201_p1  ;;  %s3095_s10 = scalar_lea.hbm %s3638_s3, 20480 }
   0x5   : > { %s3647_s29 = scalar_select %p3194_p3, 1, 0 }
   0x6   : > { %s3646_s28 = scalar_select %p3188_p2, 1, 0 }
   0x7   : > { %p2701_p4 = pneg %p3188_p2  ;;  %p3096_p6 = scmp.ne.s32.totalorder %s3638_s3, %s3095_s10 }
   0x8   : > { %p3102_p10 = scmp.lt.u32.totalorder %s3095_s10, %s3638_s3 }
   0x9   : > { %p3202_p5 = pnand %p3194_p3, %p2701_p4 }
   0xb   : > { %p3097_p7 = pneg %p3202_p5 }
   0xd   : > { %p3098_p8 = pnand %p3097_p7, %p3096_p6 }
   0xf   : > { %p3099_p9 = pneg %p3098_p8 }
  0x11   : > { %p3104_p11 = pnand %p3102_p10, %p3099_p9 }
  0x13   : > { %3107 = shalt.err (!%p3104_p11)
}
  0x14   : > { %s3108_s15 = scalar_lea.vmem %s220_s27, 20480  ;;  %p3116_p1 = scmp.lt.s32.totalorder %s220_s27, %s220_s27 }
  0x15   : > { %p3109_p12 = scmp.ne.s32.totalorder %s220_s27, %s3108_s15  ;;  %p3117_p4 = scmp.lt.s32.totalorder %s3108_s15, %s3108_s15 }
  0x17   : > { %p3111_p13 = pnand %p3109_p12, %p3097_p7  ;;  %p3118_p3 = por %p3117_p4, %p3116_p1 }
  0x19   : > { %p3112_p0 = pneg %p3111_p13 }
  0x1b   : > { %p3119_p2 = pnand %p3118_p3, %p3112_p0 }
  0x1d   : > { %3122 = shalt.err (!%p3119_p2)
}
  0x1e   : > { %s3136_s16 = smov 640   ;;  %s3137_s17 = smov 40  }
  0x1f   : > { %2704 = dma.hbm_to_vmem [thread:$0]  (!%p3202_p5), %s3638_s3, 20480, %s220_s27, [#allocation3], %s3136_s16, %s3136_s16, %s3137_s17  }
  0x20   : > { %p3649_p6 = scmp.ne.s32.totalorder %s3646_s28, 0 }
  0x21   : > { %p3650_p8 = scmp.ne.s32.totalorder (!%p3649_p6), %s3647_s29, 0 }
  0x22   : > { %254 = sbr.rel (%p3649_p6) target bundleno = 1169 (0x491), region = 48 }
  0x29   : > { %3128 = dma.done.wait (%p3650_p8), [#allocation3], 20480  }
  0x2a   : > { %3130 = vsyncadd (%p3650_p8), [#allocation3], 4294946816  ;;  %v2740_v0 = vld [vmem:[%s3636_s1 + $0x4] ss:$8 sps:$4 sm:$0xff]   ;;  %v2742_v1 = vld [vmem:[%s3636_s1] ss:$8 sps:$4 sm:$0xff]  }
  0x2b   : > { %517 = vmatprep.subr.bf16.mxu0 %v2740_v0  ;;  %v2743_v2 = vld [vmem:[%s3636_s1 + $0x14] ss:$8 sps:$4 sm:$0xff]   ;;  %v2745_v3 = vld [vmem:[%s3636_s1 + $0x10] ss:$8 sps:$4 sm:$0xff]   ;;  %v2746_v4 = vld [vmem:[%s3636_s1 + $0x24] ss:$8 sps:$4 sm:$0xff]  }
  0x2c   : > { %518 = vmatpush1.bf16.msra.mxu0 %v2742_v1  ;;  %s2394_s9 = sshll.u32 %s2387_s25, 1  ;;  %v2748_v5 = vld [vmem:[%s3636_s1 + $0x20] ss:$8 sps:$4 sm:$0xff]   ;;  %v2749_v6 = vld [vmem:[%s3636_s1 + $0x34] ss:$8 sps:$4 sm:$0xff]   ;;  %s3138_s10 = smov 112  }
  0x2d   : > { %519 = vmatprep.subr.bf16.mxu0 %v2743_v2  ;;  %p288_p2 = scmp.lt.s32.totalorder %s2394_s9, 3  ;;  %v2751_v7 = vld [vmem:[%s3636_s1 + $0x30] ss:$8 sps:$4 sm:$0xff]   ;;  %v2752_v8 = vld [vmem:[%s3636_s1 + $0x44] ss:$8 sps:$4 sm:$0xff]   ;;  %s3139_s8 = smov 96  }
  0x2e   : > { %v2754_v9 = vld [vmem:[%s3636_s1 + $0x40] ss:$8 sps:$4 sm:$0xff]   ;;  %v2755_v10 = vld [vmem:[%s3636_s1 + $0x54] ss:$8 sps:$4 sm:$0xff]   ;;  %v2757_v11 = vld [vmem:[%s3636_s1 + $0x50] ss:$8 sps:$4 sm:$0xff]  }
  0x2f   : > { %s3658_s9 = smov (!%p288_p2, %s2394_s9), 3  ;;  %v2758_v12 = vld [vmem:[%s3636_s1 + $0x64] ss:$8 sps:$4 sm:$0xff]   ;;  %v2760_v13 = vld [vmem:[%s3636_s1 + $0x60] ss:$8 sps:$4 sm:$0xff]  }
  0x30   : > { %520 = vmatpush1.bf16.msra.mxu0 %v2745_v3  ;;  %s2674_s21 = sshll.u32 %s3658_s9, 3  ;;  %v2761_v14 = vld [vmem:[%s3636_s1 + $0x74] ss:$8 sps:$4 sm:$0xff]   ;;  %v2763_v16 = vld [vmem:[%s3636_s1 + $0x70] ss:$8 sps:$4 sm:$0xff]  }
  0x31   : > { %521 = vmatprep.subr.bf16.mxu0 %v2746_v4  ;;  %s3274_s28 = scalar_lea.vmem %s3635_s0, %s2674_s21  ;;  %v2764_v17 = vld [vmem:[%s3636_s1 + $0x84] ss:$8 sps:$4 sm:$0xff]   ;;  %v2766_v18 = vld [vmem:[%s3636_s1 + $0x80] ss:$8 sps:$4 sm:$0xff]   ;;  %v2767_v19 = vld [vmem:[%s3636_s1 + $0x94] ss:$8 sps:$4 sm:$0xff]   ;;  %s298_s14 = scalar_lea.vmem %s3642_s7, %s2674_s21 }
  0x32   : > { %v2790_v15 = vld [vmem:[%s3274_s28 + $0x4] ss:$8 sps:$4 sm:$0xff]   ;;  %v2769_v20 = vld [vmem:[%s3636_s1 + $0x90] ss:$8 sps:$4 sm:$0xff]   ;;  %v2772_v22 = vld [vmem:[%s3636_s1 + $0xa0] ss:$8 sps:$4 sm:$0xff]  }
  0x33   : > { %549 = vmatprep.mubr.bf16.mxu0 %v2790_v15  ;;  %v2770_v21 = vld [vmem:[%s3636_s1 + $0xa4] ss:$8 sps:$4 sm:$0xff]   ;;  %v2773_v23 = vld [vmem:[%s3636_s1 + $0xb4] ss:$8 sps:$4 sm:$0xff]   ;;  %v2775_v24 = vld [vmem:[%s3636_s1 + $0xb0] ss:$8 sps:$4 sm:$0xff]  }
  0x34   : > { %522 = vmatpush1.bf16.msra.mxu0 %v2748_v5  ;;  %v2776_v25 = vld [vmem:[%s3636_s1 + $0xc4] ss:$8 sps:$4 sm:$0xff]   ;;  %v2778_v26 = vld [vmem:[%s3636_s1 + $0xc0] ss:$8 sps:$4 sm:$0xff]   ;;  %v2779_v27 = vld [vmem:[%s3636_s1 + $0xd4] ss:$8 sps:$4 sm:$0xff]  }
  0x35   : > { %523 = vmatprep.subr.bf16.mxu0 %v2749_v6  ;;  %v2781_v28 = vld [vmem:[%s3636_s1 + $0xd0] ss:$8 sps:$4 sm:$0xff]   ;;  %v2782_v29 = vld [vmem:[%s3636_s1 + $0xe4] ss:$8 sps:$4 sm:$0xff]   ;;  %v2784_v30 = vld [vmem:[%s3636_s1 + $0xe0] ss:$8 sps:$4 sm:$0xff]  }
  0x36   : > { %v2785_v31 = vld [vmem:[%s3636_s1 + $0xf4] ss:$8 sps:$4 sm:$0xff]   ;;  %v2787_v32 = vld [vmem:[%s3636_s1 + $0xf0] ss:$8 sps:$4 sm:$0xff]   ;;  %v2788_v33 = vld [vmem:[%s3274_s28] ss:$8 sps:$4 sm:$0xff]  }
  0x37   : > { %v2791_v34 = vld [vmem:[#allocation2 + $0x4] ss:$40 sps:$4 sm:$0xff]   ;;  %v2793_v35 = vld [vmem:[#allocation2 + $0x8] ss:$40 sps:$4 sm:$0xff]   ;;  %v2797_v38 = vld [vmem:[#allocation2 + $0x54] ss:$40 sps:$4 sm:$0xff]  }
  0x38   : > { %524 = vmatpush1.bf16.msra.mxu0 %v2751_v7  ;;  %v2795_v36 = vld [vmem:[#allocation2 + $0xc] ss:$40 sps:$4 sm:$0xff]   ;;  %v2796_v37 = vld [vmem:[#allocation2] ss:$40 sps:$4 sm:$0xff]   ;;  %1579 = vmatprep.subr.bf16.mxu1 %v2791_v34  ;;  %v2801_v39 = vld [vmem:[#allocation2 + $0x5c] ss:$40 sps:$4 sm:$0xff]  }
  0x39   : > { %525 = vmatprep.subr.bf16.mxu0 %v2752_v8  ;;  %1580 = vmatpush1.bf16.msra.mxu1 %v2796_v37  ;;  %v2799_v40 = vld [vmem:[#allocation2 + $0x58] ss:$40 sps:$4 sm:$0xff]   ;;  %v2803_v42 = vld [vmem:[#allocation2 + $0xa4] ss:$40 sps:$4 sm:$0xff]   ;;  %v2805_v44 = vld [vmem:[#allocation2 + $0xa8] ss:$40 sps:$4 sm:$0xff]  }
  0x3a   : > { %v2802_v41 = vld [vmem:[#allocation2 + $0x50] ss:$40 sps:$4 sm:$0xff]   ;;  %1581 = vmatprep.subr.bf16.mxu1 %v2797_v38  ;;  %v2807_v43 = vld [vmem:[#allocation2 + $0xac] ss:$40 sps:$4 sm:$0xff]   ;;  %v2808_v45 = vld [vmem:[#allocation2 + $0xa0] ss:$40 sps:$4 sm:$0xff]  }
  0x3b   : > { %v2809_v46 = vld [vmem:[#allocation2 + $0xf4] ss:$40 sps:$4 sm:$0xff]   ;;  %v2811_v48 = vld [vmem:[#allocation2 + $0xf8] ss:$40 sps:$4 sm:$0xff]   ;;  %v2815_v50 = vld [vmem:[#allocation2 + $0x144] ss:$40 sps:$4 sm:$0xff]  }
  0x3c   : > { %526 = vmatpush1.bf16.msra.mxu0 %v2754_v9  ;;  %v2813_v47 = vld [vmem:[#allocation2 + $0xfc] ss:$40 sps:$4 sm:$0xff]   ;;  %v2814_v49 = vld [vmem:[#allocation2 + $0xf0] ss:$40 sps:$4 sm:$0xff]   ;;  %v2819_v51 = vld [vmem:[#allocation2 + $0x14c] ss:$40 sps:$4 sm:$0xff]  }
  0x3d   : > { %527 = vmatprep.subr.bf16.mxu0 %v2755_v10  ;;  %1582 = vmatpush1.bf16.msra.mxu1 %v2802_v41  ;;  %v2817_v52 = vld [vmem:[#allocation2 + $0x148] ss:$40 sps:$4 sm:$0xff]   ;;  %v2821_v54 = vld [vmem:[#allocation2 + $0x194] ss:$40 sps:$4 sm:$0xff]   ;;  %v2823_v56 = vld [vmem:[#allocation2 + $0x198] ss:$40 sps:$4 sm:$0xff]  }
  0x3e   : > { %1583 = vmatprep.subr.bf16.mxu1 %v2803_v42  ;;  %v2820_v53 = vld [vmem:[#allocation2 + $0x140] ss:$40 sps:$4 sm:$0xff]   ;;  %v2825_v55 = vld [vmem:[#allocation2 + $0x19c] ss:$40 sps:$4 sm:$0xff]   ;;  %v2826_v57 = vld [vmem:[#allocation2 + $0x190] ss:$40 sps:$4 sm:$0xff]  }
  0x3f   : > { %v2827_v58 = vld [vmem:[#allocation2 + $0x1e4] ss:$40 sps:$4 sm:$0xff]   ;;  %v2829_v60 = vld [vmem:[#allocation2 + $0x1e8] ss:$40 sps:$4 sm:$0xff]   ;;  %v2833_v62 = vld [vmem:[#allocation2 + $0x234] ss:$40 sps:$4 sm:$0xff]  }
  0x40   : > { %528 = vmatpush1.bf16.msra.mxu0 %v2757_v11  ;;  %v2831_v59 = vld [vmem:[#allocation2 + $0x1ec] ss:$40 sps:$4 sm:$0xff]   ;;  %v2832_v61 = vld [vmem:[#allocation2 + $0x1e0] ss:$40 sps:$4 sm:$0xff]   ;;  %v2837_v63 = vld [vmem:[#allocation2 + $0x23c] ss:$40 sps:$4 sm:$0xff]  }
  0x41   : > { %529 = vmatprep.subr.bf16.mxu0 %v2758_v12  ;;  %1584 = vmatpush1.bf16.msra.mxu1 %v2808_v45  ;;  %v2835_v0 = vld [vmem:[#allocation2 + $0x238] ss:$40 sps:$4 sm:$0xff]   ;;  %v2839_v2 = vld [vmem:[#allocation2 + $0x284] ss:$40 sps:$4 sm:$0xff]   ;;  %v2841_v4 = vld [vmem:[#allocation2 + $0x288] ss:$40 sps:$4 sm:$0xff]  }
  0x42   : > { %1585 = vmatprep.subr.bf16.mxu1 %v2809_v46  ;;  %v2838_v1 = vld [vmem:[#allocation2 + $0x230] ss:$40 sps:$4 sm:$0xff]   ;;  %v2843_v3 = vld [vmem:[#allocation2 + $0x28c] ss:$40 sps:$4 sm:$0xff]   ;;  %v2844_v5 = vld [vmem:[#allocation2 + $0x280] ss:$40 sps:$4 sm:$0xff]  }
  0x43   : > { %v2845_v6 = vld [vmem:[#allocation2 + $0x2d4] ss:$40 sps:$4 sm:$0xff]   ;;  %v2847_v8 = vld [vmem:[#allocation2 + $0x2d8] ss:$40 sps:$4 sm:$0xff]   ;;  %v2851_v10 = vld [vmem:[#allocation2 + $0x324] ss:$40 sps:$4 sm:$0xff]  }
  0x44   : > { %530 = vmatpush1.bf16.msra.mxu0 %v2760_v13  ;;  %v2849_v7 = vld [vmem:[#allocation2 + $0x2dc] ss:$40 sps:$4 sm:$0xff]   ;;  %v2850_v9 = vld [vmem:[#allocation2 + $0x2d0] ss:$40 sps:$4 sm:$0xff]   ;;  %v2855_v11 = vld [vmem:[#allocation2 + $0x32c] ss:$40 sps:$4 sm:$0xff]  }
  0x45   : > { %531 = vmatprep.subr.bf16.mxu0 %v2761_v14  ;;  %1586 = vmatpush1.bf16.msra.mxu1 %v2814_v49  ;;  %v2853_v12 = vld [vmem:[#allocation2 + $0x328] ss:$40 sps:$4 sm:$0xff]   ;;  %v2857_v14 = vld [vmem:[#allocation2 + $0x374] ss:$40 sps:$4 sm:$0xff]  }
  0x46   : > { %1587 = vmatprep.subr.bf16.mxu1 %v2815_v50  ;;  %v2856_v13 = vld [vmem:[#allocation2 + $0x320] ss:$40 sps:$4 sm:$0xff]   ;;  %v2861_v15 = vld [vmem:[#allocation2 + $0x37c] ss:$40 sps:$4 sm:$0xff]  }
  0x47   : > { %v2877_v37 = vld [vmem:[#allocation2 + $0x468] ss:$40 sps:$4 sm:$0xff]   ;;  %v2881_v49 = vld [vmem:[#allocation2 + $0x4b4] ss:$40 sps:$4 sm:$0xff]  }
  0x48   : > { %532 = vmatpush1.bf16.msra.mxu0 %v2763_v16  ;;  %v2859_v16 = vld [vmem:[#allocation2 + $0x378] ss:$40 sps:$4 sm:$0xff]   ;;  %v2885_v50 = vld [vmem:[#allocation2 + $0x4bc] ss:$40 sps:$4 sm:$0xff]  }
  0x49   : > { %533 = vmatprep.subr.bf16.mxu0 %v2764_v17  ;;  %1588 = vmatpush1.bf16.msra.mxu1 %v2820_v53  ;;  %v2862_v17 = vld [vmem:[#allocation2 + $0x370] ss:$40 sps:$4 sm:$0xff]  }
  0x4a   : > { %1589 = vmatprep.subr.bf16.mxu1 %v2821_v54  ;;  %v2883_v53 = vld [vmem:[#allocation2 + $0x4b8] ss:$40 sps:$4 sm:$0xff]  }
  0x4b   : > { %v2886_v54 = vld [vmem:[#allocation2 + $0x4b0] ss:$40 sps:$4 sm:$0xff]  }
  0x4c   : > { %534 = vmatpush1.bf16.msra.mxu0 %v2766_v18  ;;  %v2863_v18 = vld [vmem:[#allocation2 + $0x3c4] ss:$40 sps:$4 sm:$0xff]  }
  0x4d   : > { %535 = vmatprep.subr.bf16.mxu0 %v2767_v19  ;;  %1590 = vmatpush1.bf16.msra.mxu1 %v2826_v57  ;;  %v2867_v19 = vld [vmem:[#allocation2 + $0x3cc] ss:$40 sps:$4 sm:$0xff]  }
  0x4e   : > { %1591 = vmatprep.subr.bf16.mxu1 %v2827_v58 }
  0x50   : > { %536 = vmatpush1.bf16.msra.mxu0 %v2769_v20  ;;  %v2865_v20 = vld [vmem:[#allocation2 + $0x3c8] ss:$40 sps:$4 sm:$0xff]  }
  0x51   : > { %537 = vmatprep.subr.bf16.mxu0 %v2770_v21  ;;  %1592 = vmatpush1.bf16.msra.mxu1 %v2832_v61  ;;  %v2868_v21 = vld [vmem:[#allocation2 + $0x3c0] ss:$40 sps:$4 sm:$0xff]  }
  0x52   : > { %1593 = vmatprep.subr.bf16.mxu1 %v2833_v62 }
  0x54   : > { %538 = vmatpush1.bf16.msra.mxu0 %v2772_v22  ;;  %v2869_v22 = vld [vmem:[#allocation2 + $0x414] ss:$40 sps:$4 sm:$0xff]  }
  0x55   : > { %539 = vmatprep.subr.bf16.mxu0 %v2773_v23  ;;  %1594 = vmatpush1.bf16.msra.mxu1 %v2838_v1  ;;  %v2873_v23 = vld [vmem:[#allocation2 + $0x41c] ss:$40 sps:$4 sm:$0xff]  }
  0x56   : > { %1595 = vmatprep.subr.bf16.mxu1 %v2839_v2 }
  0x58   : > { %540 = vmatpush1.bf16.msra.mxu0 %v2775_v24  ;;  %v2871_v24 = vld [vmem:[#allocation2 + $0x418] ss:$40 sps:$4 sm:$0xff]  }
  0x59   : > { %541 = vmatprep.subr.bf16.mxu0 %v2776_v25  ;;  %1596 = vmatpush1.bf16.msra.mxu1 %v2844_v5  ;;  %v337_v25 = vlaneseq }
  0x5a   : > { %1597 = vmatprep.subr.bf16.mxu1 %v2845_v6 }
  0x5c   : > { %542 = vmatpush1.bf16.msra.mxu0 %v2778_v26  ;;  %v3338_v26 = vshrl.u32 %v337_v25, 7 }
  0x5d   : > { %543 = vmatprep.subr.bf16.mxu0 %v2779_v27  ;;  %1598 = vmatpush1.bf16.msra.mxu1 %v2850_v9  ;;  %v3359_v9 = vand.u32 127, %v337_v25 }
  0x5e   : > { %1599 = vmatprep.subr.bf16.mxu1 %v2851_v10  ;;  %v339_v27 = vsub.s32 0, %v3338_v26  ;;  %vm570_vm0 = vcmp.lt.s32.totalorder %v3338_v26, 7  ;;  %v598_v5 = vadd.s32 8, %v3338_v26  ;;  %v603_v10 = vand.u32 1, %v3338_v26 }
  0x5f   : > { %vm589_vm3 = vcmp.lt.s32.totalorder %v3359_v9, 112  ;;  %vm1798_vm7 = vcmp.lt.s32.totalorder %v3338_v26, 4  ;;  %vm1807_vm8 = vcmp.lt.s32.totalorder %v3338_v26, 2  ;;  %vm1824_vm9 = vcmp.lt.s32.totalorder %v3338_v26, 6 }
  0x60   : > { %544 = vmatpush1.bf16.msra.mxu0 %v2781_v28  ;;  %v335_v28 = vld [vmem:[%s3637_s2] sm:$0x3]  ;;  %v600_v6 = vand.u32 15, %v598_v5  ;;  %vm605_vm4 = vcmp.eq.s32.totalorder %v603_v10, 0  ;;  %vm1885_vm10 = vcmp.lt.s32.totalorder %v3359_v9, 96 }
  0x61   : > { %545 = vmatprep.subr.bf16.mxu0 %v2782_v29  ;;  %1600 = vmatpush1.bf16.msra.mxu1 %v2856_v13  ;;  %v343_v29 = vsub.s32 1, %v3338_v26  ;;  %v2950_v10 = vld [vmem:[#allocation2 + $0x338] ss:$40 sps:$4 sm:$0xff]  }
  0x62   : > { %1601 = vmatprep.subr.bf16.mxu1 %v2857_v14  ;;  %vm3362_vm1 = vcmp.lt.s32.totalorder %v600_v6, 12  ;;  %v2949_v6 = vld [vmem:[#allocation2 + $0x334] ss:$40 sps:$4 sm:$0xff]  }
  0x64   : > { %546 = vmatpush1.bf16.msra.mxu0 %v2784_v30  ;;  %v340_v30 = vrot.slane %v335_v28, %v339_v27 }
  0x65   : > { %547 = vmatprep.subr.bf16.mxu0 %v2785_v31  ;;  %1602 = vmatpush1.bf16.msra.mxu1 %v2862_v17  ;;  %v344_v31 = vrot.slane %v335_v28, %v343_v29 }
  0x66   : > { %1603 = vmatprep.subr.bf16.mxu1 %v2863_v18 }
  0x68   : > { %548 = vmatpush1.bf16.msra.mxu0 %v2787_v32  ;;  %v2874_v32 = vld [vmem:[#allocation2 + $0x410] ss:$40 sps:$4 sm:$0xff]  }
  0x69   : > { %1622 = vmatprep.subr.bf16.mxu0 %v2795_v36  ;;  %1604 = vmatpush1.bf16.msra.mxu1 %v2868_v21  ;;  %v2875_v36 = vld [vmem:[#allocation2 + $0x464] ss:$40 sps:$4 sm:$0xff]  }
  0x6a   : > { %1605 = vmatprep.subr.bf16.mxu1 %v2869_v22 }
  0x6b   : > { %550 = vmatmul.mubr.bf16.vlgmr.msra.gmra.mrb[0].mxu0 %v2788_v33 }
  0x6c   : > { %1623 = vmatpush1.bf16.msra.mxu0 %v2793_v35 }
  0x6d   : > { %1624 = vmatprep.subr.bf16.mxu0 %v2801_v39  ;;  %1606 = vmatpush1.bf16.msra.mxu1 %v2874_v32  ;;  %v2887_v32 = vld [vmem:[#allocation2 + $0x10] ss:$40 sps:$4 sm:$0xff]  }
  0x6e   : > { %1607 = vmatprep.subr.bf16.mxu1 %v2875_v36  ;;  %v2893_v36 = vld [vmem:[#allocation2 + $0x60] ss:$40 sps:$4 sm:$0xff]  }
  0x70   : > { %1625 = vmatpush1.bf16.msra.mxu0 %v2799_v40  ;;  %v2879_v40 = vld [vmem:[#allocation2 + $0x46c] ss:$40 sps:$4 sm:$0xff]  }
  0x71   : > { %1626 = vmatprep.subr.bf16.mxu0 %v2807_v43 }
  0x74   : > { %1627 = vmatpush1.bf16.msra.mxu0 %v2805_v44  ;;  %v2880_v44 = vld [vmem:[#allocation2 + $0x460] ss:$40 sps:$4 sm:$0xff]  }
  0x75   : > { %1628 = vmatprep.subr.bf16.mxu0 %v2813_v47  ;;  %1608 = vmatpush1.bf16.msra.mxu1 %v2880_v44  ;;  %v2905_v44 = vld [vmem:[#allocation2 + $0x100] ss:$40 sps:$4 sm:$0xff]  }
  0x76   : > { %1609 = vmatprep.subr.bf16.mxu1 %v2881_v49  ;;  %v2914_v49 = vld [vmem:[#allocation2 + $0x158] ss:$40 sps:$4 sm:$0xff]  }
  0x78   : > { %1629 = vmatpush1.bf16.msra.mxu0 %v2811_v48 }
  0x79   : > { %1630 = vmatprep.subr.bf16.mxu0 %v2819_v51  ;;  %1610 = vmatpush1.bf16.msra.mxu1 %v2886_v54  ;;  %v2925_v54 = vld [vmem:[#allocation2 + $0x1f4] ss:$40 sps:$4 sm:$0xff]  }
  0x7c   : > { %1631 = vmatpush1.bf16.msra.mxu0 %v2817_v52 }
  0x7d   : > { %1632 = vmatprep.subr.bf16.mxu0 %v2825_v55 }
  0x80   : > { %1633 = vmatpush1.bf16.msra.mxu0 %v2823_v56 }
  0x81   : > { %1634 = vmatprep.subr.bf16.mxu0 %v2831_v59 }
  0x84   : > { %1635 = vmatpush1.bf16.msra.mxu0 %v2829_v60 }
  0x85   : > { %1636 = vmatprep.subr.bf16.mxu0 %v2837_v63  ;;  %v2889_v63 = vld [vmem:[#allocation2 + $0x14] ss:$40 sps:$4 sm:$0xff]  }
  0x86   : > { %1665 = vmatprep.subr.bf16.mxu1 %v2889_v63  ;;  %v2940_v63 = vld [vmem:[#allocation2 + $0x29c] ss:$40 sps:$4 sm:$0xff]  }
  0x88   : > { %1637 = vmatpush1.bf16.msra.mxu0 %v2835_v0  ;;  %v2892_v0 = vld [vmem:[#allocation2 + $0x1c] ss:$40 sps:$4 sm:$0xff]  }
  0x89   : > { %1638 = vmatprep.subr.bf16.mxu0 %v2843_v3 }
  0x8c   : > { %1639 = vmatpush1.bf16.msra.mxu0 %v2841_v4 }
  0x8d   : > { %1640 = vmatprep.subr.bf16.mxu0 %v2849_v7  ;;  %v604_v7 = vand.u32 1, %v598_v5  ;;  %v2944_v5 = vld [vmem:[#allocation2 + $0x2e8] ss:$40 sps:$4 sm:$0xff]  }
  0x8f   : > { %vm3366_vm2 = vcmp.eq.s32.totalorder %v604_v7, 0  ;;  %v2952_v7 = vld [vmem:[#allocation2 + $0x33c] ss:$40 sps:$4 sm:$0xff]  }
  0x90   : > { %1641 = vmatpush1.bf16.msra.mxu0 %v2847_v8  ;;  %vm608_vm5 = vmand %vm3362_vm1, %vm3366_vm2 }
  0x91   : > { %1642 = vmatprep.subr.bf16.mxu0 %v2855_v11  ;;  %vm3375_vm6 = vmpackc.low %vm608_vm5, %vm605_vm4  ;;  %v2955_v11 = vld [vmem:[#allocation2 + $0x384] ss:$40 sps:$4 sm:$0xff]  }
  0x94   : > { %1643 = vmatpush1.bf16.msra.mxu0 %v2853_v12  ;;  %v2958_v12 = vld [vmem:[#allocation2 + $0x38c] ss:$40 sps:$4 sm:$0xff]  }
  0x95   : > { %1644 = vmatprep.subr.bf16.mxu0 %v2861_v15 }
  0x98   : > { %1645 = vmatpush1.bf16.msra.mxu0 %v2859_v16 }
  0x99   : > { %1646 = vmatprep.subr.bf16.mxu0 %v2867_v19 }
  0x9c   : > { %1647 = vmatpush1.bf16.msra.mxu0 %v2865_v20 }
  0x9d   : > { %1648 = vmatprep.subr.bf16.mxu0 %v2873_v23 }
  0xa0   : > { %1649 = vmatpush1.bf16.msra.mxu0 %v2871_v24 }
  0xa1   : > { %1650 = vmatprep.subr.bf16.mxu0 %v2879_v40  ;;  %v2899_v40 = vld [vmem:[#allocation2 + $0xb0] ss:$40 sps:$4 sm:$0xff]  }
  0xa4   : > { %1651 = vmatpush1.bf16.msra.mxu0 %v2877_v37  ;;  %v2896_v37 = vld [vmem:[#allocation2 + $0x68] ss:$40 sps:$4 sm:$0xff]  }
  0xa5   : > { %1652 = vmatprep.subr.bf16.mxu0 %v2885_v50  ;;  %v2919_v50 = vld [vmem:[#allocation2 + $0x1a4] ss:$40 sps:$4 sm:$0xff]  }
  0xa8   : > { %1653 = vmatpush1.bf16.msra.mxu0 %v2883_v53  ;;  %v2920_v53 = vld [vmem:[#allocation2 + $0x1a8] ss:$40 sps:$4 sm:$0xff]  }
  0xa9   : > { %1708 = vmatprep.subr.bf16.mxu0 %v2892_v0  ;;  %v2935_v0 = vld [vmem:[#allocation2 + $0x290] ss:$40 sps:$4 sm:$0xff]  }
 0x13e   : > { %v551_v33 = vpop.f32.mrb[0].mxu0 }
 0x13f   : > { %v552_v34 = vadd.f32 %v551_v33, %v340_v30  ;;  %v553_v35 = vpop.f32.mrb[1].mxu0  ;;  %v2890_v33 = vld [vmem:[#allocation2 + $0x18] ss:$40 sps:$4 sm:$0xff]  }
 0x140   : > { %v554_v38 = vadd.f32 %v553_v35, %v344_v31  ;;  %v555_v39 = vpop.f32.mrb[2].mxu0  ;;  %v2898_v35 = vld [vmem:[#allocation2 + $0x6c] ss:$40 sps:$4 sm:$0xff]  }
 0x141   : > { %v560_v41 = vmax.f32 %v552_v34, 0.0  ;;  %v556_v42 = vadd.f32 %v555_v39, %v340_v30  ;;  %v557_v43 = vpop.f32.mrb[3].mxu0  ;;  %v2895_v34 = vld [vmem:[#allocation2 + $0x64] ss:$40 sps:$4 sm:$0xff]  }
 0x142   : > { %v561_v45 = vmax.f32 %v554_v38, 0.0  ;;  %v558_v46 = vadd.f32 %v557_v43, %v344_v31  ;;  %v2901_v38 = vld [vmem:[#allocation2 + $0xb4] ss:$40 sps:$4 sm:$0xff]  }
 0x143   : > { %v562_v47 = vmax.f32 %v556_v42, 0.0  ;;  %v564_v51 = vrot.slane %v560_v41, 1  ;;  %v2904_v39 = vld [vmem:[#allocation2 + $0xbc] ss:$40 sps:$4 sm:$0xff]   ;;  %v2910_v43 = vld [vmem:[#allocation2 + $0x10c] ss:$40 sps:$4 sm:$0xff]  }
 0x144   : > { %v563_v48 = vmax.f32 %v558_v46, 0.0  ;;  %v565_v55 = vrot.slane %v561_v45, 1  ;;  %v2907_v42 = vld [vmem:[#allocation2 + $0x104] ss:$40 sps:$4 sm:$0xff]   ;;  %v2913_v46 = vld [vmem:[#allocation2 + $0x154] ss:$40 sps:$4 sm:$0xff]  }
 0x145   : > { %v566_v52 = vrot.slane %v562_v47, 1 }
 0x146   : > { %v567_v56 = vrot.slane %v563_v48, 1 }
 0x147   : > { %v573_v57 = vsel %vm570_vm0, %v566_v52, %v564_v51  ;;  %v571_v58 = vsel %vm570_vm0, %v564_v51, %v566_v52  ;;  %v2922_v51 = vld [vmem:[#allocation2 + $0x1ac] ss:$40 sps:$4 sm:$0xff]   ;;  %v2917_v52 = vld [vmem:[#allocation2 + $0x1a0] ss:$40 sps:$4 sm:$0xff]  }
 0x148   : > { %v577_v59 = vmax.f32 %v562_v47, %v573_v57  ;;  %v574_v60 = vsel %vm570_vm0, %v567_v56, %v565_v55  ;;  %v575_v61 = vmax.f32 %v560_v41, %v571_v58  ;;  %v572_v62 = vsel %vm570_vm0, %v565_v55, %v567_v56  ;;  %v2902_v41 = vld [vmem:[#allocation2 + $0xb8] ss:$40 sps:$4 sm:$0xff]   ;;  %v2916_v47 = vld [vmem:[#allocation2 + $0x15c] ss:$40 sps:$4 sm:$0xff]  }
 0x149   : > { %v578_v1 = vmax.f32 %v563_v48, %v574_v60  ;;  %v576_v2 = vmax.f32 %v561_v45, %v572_v62  ;;  %v2908_v45 = vld [vmem:[#allocation2 + $0x108] ss:$40 sps:$4 sm:$0xff]   ;;  %v2928_v55 = vld [vmem:[#allocation2 + $0x1fc] ss:$40 sps:$4 sm:$0xff]   ;;  %v2926_v57 = vld [vmem:[#allocation2 + $0x1f8] ss:$40 sps:$4 sm:$0xff]  }
 0x14a   : > { %v2720_v3 = vpack.i.bf16 %v577_v59, %v575_v61  ;;  %v2911_v48 = vld [vmem:[#allocation2 + $0x150] ss:$40 sps:$4 sm:$0xff]   ;;  %v2931_v58 = vld [vmem:[#allocation2 + $0x244] ss:$40 sps:$4 sm:$0xff]   ;;  %v2929_v60 = vld [vmem:[#allocation2 + $0x240] ss:$40 sps:$4 sm:$0xff]  }
 0x14b   : > { %v2725_v4 = vpack.i.bf16 %v578_v1, %v576_v2  ;;  %v2923_v56 = vld [vmem:[#allocation2 + $0x1f0] ss:$40 sps:$4 sm:$0xff]   ;;  %v2937_v62 = vld [vmem:[#allocation2 + $0x294] ss:$40 sps:$4 sm:$0xff]  }
 0x14c   : > { %2721 = vrot.lane.b32.xlu0 %v2720_v3, %s3138_s10  ;;  %v2946_v3 = vld [vmem:[#allocation2 + $0x2ec] ss:$40 sps:$4 sm:$0xff]  }
 0x150   : > { %2726 = vrot.lane.b32.xlu0 %v2725_v4, %s3138_s10  ;;  %v2941_v4 = vld [vmem:[#allocation2 + $0x2e0] ss:$40 sps:$4 sm:$0xff]  }
 0x1be   : > { %v2722_v8 = vpop.permute.xlu0 %2721 }
 0x1bf   : > { %v2724_v14 = vunpack.i.h.bf16 %v2722_v8  ;;  %v2723_v15 = vunpack.i.l.bf16 %v2722_v8  ;;  %v2947_v8 = vld [vmem:[#allocation2 + $0x330] ss:$40 sps:$4 sm:$0xff]  }
 0x1c2   : > { %v2727_v13 = vpop.permute.xlu0 %2726 }
 0x1c3   : > { %v2729_v16 = vunpack.i.h.bf16 %v2727_v13  ;;  %v2728_v17 = vunpack.i.l.bf16 %v2727_v13  ;;  %v2953_v13 = vld [vmem:[#allocation2 + $0x380] ss:$40 sps:$4 sm:$0xff]  }
 0x1c5   : > { %v590_v18 = vsel %vm589_vm3, %v2723_v15, %v2728_v17  ;;  %v591_v19 = vsel %vm589_vm3, %v2724_v14, %v2729_v16  ;;  %v592_v20 = vsel %vm589_vm3, %v2728_v17, %v2723_v15  ;;  %v593_v21 = vsel %vm589_vm3, %v2729_v16, %v2724_v14  ;;  %v2956_v14 = vld [vmem:[#allocation2 + $0x388] ss:$40 sps:$4 sm:$0xff]   ;;  %v2961_v15 = vld [vmem:[#allocation2 + $0x3d4] ss:$40 sps:$4 sm:$0xff]  }
 0x1c6   : > { %v594_v22 = vmax.f32 %v575_v61, %v590_v18  ;;  %v595_v23 = vmax.f32 %v576_v2, %v592_v20  ;;  %v596_v24 = vmax.f32 %v577_v59, %v591_v19  ;;  %v597_v25 = vmax.f32 %v578_v1, %v593_v21  ;;  %v2934_v59 = vld [vmem:[#allocation2 + $0x24c] ss:$40 sps:$4 sm:$0xff]   ;;  %v2932_v61 = vld [vmem:[#allocation2 + $0x248] ss:$40 sps:$4 sm:$0xff]   ;;  %v2938_v1 = vld [vmem:[#allocation2 + $0x298] ss:$40 sps:$4 sm:$0xff]  }
 0x1c7   : > { %v2943_v2 = vld [vmem:[#allocation2 + $0x2e4] ss:$40 sps:$4 sm:$0xff]   ;;  %v2959_v17 = vld [vmem:[#allocation2 + $0x3d0] ss:$40 sps:$4 sm:$0xff]   ;;  %v2965_v21 = vld [vmem:[#allocation2 + $0x420] ss:$40 sps:$4 sm:$0xff]  }
 0x1c8   : > { %v3379_v30 = vpack.c.bf16 %v597_v25, %v595_v23  ;;  %v3381_v31 = vpack.c.bf16 %v596_v24, %v594_v22  ;;  %v2964_v16 = vld [vmem:[#allocation2 + $0x3dc] ss:$40 sps:$4 sm:$0xff]   ;;  %v2962_v18 = vld [vmem:[#allocation2 + $0x3d8] ss:$40 sps:$4 sm:$0xff]   ;;  %v2970_v20 = vld [vmem:[#allocation2 + $0x42c] ss:$40 sps:$4 sm:$0xff]  }
 0x1c9   : > { %v2967_v19 = vld [vmem:[#allocation2 + $0x424] ss:$40 sps:$4 sm:$0xff]   ;;  %v2968_v22 = vld [vmem:[#allocation2 + $0x428] ss:$40 sps:$4 sm:$0xff]   ;;  %v2973_v23 = vld [vmem:[#allocation2 + $0x474] ss:$40 sps:$4 sm:$0xff]  }
 0x1ca   : > { %2595 = vmatprep.mubr.msk.bf16.mxu1 %vm3375_vm6, %v3379_v30  ;;  %2601 = vmatprep.mubr.msk.bf16.mxu0 %vm3375_vm6, %v3379_v30  ;;  %v2976_v24 = vld [vmem:[#allocation2 + $0x47c] ss:$40 sps:$4 sm:$0xff]   ;;  %v2971_v25 = vld [vmem:[#allocation2 + $0x470] ss:$40 sps:$4 sm:$0xff]  }
 0x1cb   : > { %2598 = vmatmul.mubr.msk.bf16.vlgmr.msra.gmra.mrb[0].mxu1 %vm3375_vm6, %v3381_v31  ;;  %2604 = vmatmul.mubr.msk.bf16.vlgmr.msra.gmra.mrb[4].mxu0 %vm3375_vm6, %v3381_v31 }
 0x1cc   : > { %1666 = vmatpush1.bf16.msra.mxu1 %v2887_v32  ;;  %1709 = vmatpush1.bf16.msra.mxu0 %v2890_v33  ;;  %v2974_v32 = vld [vmem:[#allocation2 + $0x478] ss:$40 sps:$4 sm:$0xff]   ;;  %v2979_v33 = vld [vmem:[#allocation2 + $0x4c4] ss:$40 sps:$4 sm:$0xff]  }
 0x1cd   : > { %2607 = vmatprep.mubr.msk.bf16.mxu1 %vm3375_vm6, %v3379_v30  ;;  %2613 = vmatprep.mubr.msk.bf16.mxu0 %vm3375_vm6, %v3379_v30 }
 0x1ce   : > { %1667 = vmatprep.subr.bf16.mxu1 %v2895_v34  ;;  %1710 = vmatprep.subr.bf16.mxu0 %v2898_v35  ;;  %v2982_v34 = vld [vmem:[#allocation2 + $0x4cc] ss:$40 sps:$4 sm:$0xff]   ;;  %v2977_v35 = vld [vmem:[#allocation2 + $0x4c0] ss:$40 sps:$4 sm:$0xff]  }
 0x1d0   : > { %1668 = vmatpush1.bf16.msra.mxu1 %v2893_v36  ;;  %1711 = vmatpush1.bf16.msra.mxu0 %v2896_v37  ;;  %v2980_v36 = vld [vmem:[#allocation2 + $0x4c8] ss:$40 sps:$4 sm:$0xff]   ;;  %v2985_v37 = vld [vmem:[#allocation2 + $0x24] ss:$40 sps:$4 sm:$0xff]  }
 0x1d1   : > { %1669 = vmatprep.subr.bf16.mxu1 %v2901_v38  ;;  %1712 = vmatprep.subr.bf16.mxu0 %v2904_v39  ;;  %v2983_v38 = vld [vmem:[#allocation2 + $0x20] ss:$40 sps:$4 sm:$0xff]   ;;  %v2988_v39 = vld [vmem:[#allocation2 + $0x74] ss:$40 sps:$4 sm:$0xff]  }
 0x1d4   : > { %1670 = vmatpush1.bf16.msra.mxu1 %v2899_v40  ;;  %1713 = vmatpush1.bf16.msra.mxu0 %v2902_v41  ;;  %v2986_v40 = vld [vmem:[#allocation2 + $0x70] ss:$40 sps:$4 sm:$0xff]   ;;  %v2991_v41 = vld [vmem:[#allocation2 + $0xc4] ss:$40 sps:$4 sm:$0xff]  }
 0x1d5   : > { %1671 = vmatprep.subr.bf16.mxu1 %v2907_v42  ;;  %1714 = vmatprep.subr.bf16.mxu0 %v2910_v43  ;;  %v2989_v42 = vld [vmem:[#allocation2 + $0xc0] ss:$40 sps:$4 sm:$0xff]   ;;  %v2994_v43 = vld [vmem:[#allocation2 + $0x114] ss:$40 sps:$4 sm:$0xff]  }
 0x1d8   : > { %1672 = vmatpush1.bf16.msra.mxu1 %v2905_v44  ;;  %1715 = vmatpush1.bf16.msra.mxu0 %v2908_v45  ;;  %v2992_v44 = vld [vmem:[#allocation2 + $0x110] ss:$40 sps:$4 sm:$0xff]   ;;  %v2997_v45 = vld [vmem:[#allocation2 + $0x164] ss:$40 sps:$4 sm:$0xff]  }
 0x1d9   : > { %1673 = vmatprep.subr.bf16.mxu1 %v2913_v46  ;;  %1716 = vmatprep.subr.bf16.mxu0 %v2916_v47  ;;  %v2995_v46 = vld [vmem:[#allocation2 + $0x160] ss:$40 sps:$4 sm:$0xff]   ;;  %v3000_v47 = vld [vmem:[#allocation2 + $0x1b4] ss:$40 sps:$4 sm:$0xff]  }
 0x1dc   : > { %1674 = vmatpush1.bf16.msra.mxu1 %v2911_v48  ;;  %1717 = vmatpush1.bf16.msra.mxu0 %v2914_v49  ;;  %v2998_v48 = vld [vmem:[#allocation2 + $0x1b0] ss:$40 sps:$4 sm:$0xff]   ;;  %v3003_v49 = vld [vmem:[#allocation2 + $0x204] ss:$40 sps:$4 sm:$0xff]  }
 0x1dd   : > { %1675 = vmatprep.subr.bf16.mxu1 %v2919_v50  ;;  %1718 = vmatprep.subr.bf16.mxu0 %v2922_v51  ;;  %v3006_v50 = vld [vmem:[#allocation2 + $0x254] ss:$40 sps:$4 sm:$0xff]   ;;  %v3004_v51 = vld [vmem:[#allocation2 + $0x250] ss:$40 sps:$4 sm:$0xff]  }
 0x1e0   : > { %1676 = vmatpush1.bf16.msra.mxu1 %v2917_v52  ;;  %1719 = vmatpush1.bf16.msra.mxu0 %v2920_v53  ;;  %v3009_v52 = vld [vmem:[#allocation2 + $0x2a4] ss:$40 sps:$4 sm:$0xff]   ;;  %v3007_v53 = vld [vmem:[#allocation2 + $0x2a0] ss:$40 sps:$4 sm:$0xff]  }
 0x1e1   : > { %1677 = vmatprep.subr.bf16.mxu1 %v2925_v54  ;;  %1720 = vmatprep.subr.bf16.mxu0 %v2928_v55  ;;  %v3012_v54 = vld [vmem:[#allocation2 + $0x2f4] ss:$40 sps:$4 sm:$0xff]   ;;  %v3010_v55 = vld [vmem:[#allocation2 + $0x2f0] ss:$40 sps:$4 sm:$0xff]  }
 0x1e4   : > { %1678 = vmatpush1.bf16.msra.mxu1 %v2923_v56  ;;  %1721 = vmatpush1.bf16.msra.mxu0 %v2926_v57  ;;  %v3015_v56 = vld [vmem:[#allocation2 + $0x344] ss:$40 sps:$4 sm:$0xff]   ;;  %v3013_v57 = vld [vmem:[#allocation2 + $0x340] ss:$40 sps:$4 sm:$0xff]  }
 0x1e5   : > { %1679 = vmatprep.subr.bf16.mxu1 %v2931_v58  ;;  %1722 = vmatprep.subr.bf16.mxu0 %v2934_v59  ;;  %v3018_v58 = vld [vmem:[#allocation2 + $0x394] ss:$40 sps:$4 sm:$0xff]   ;;  %v3016_v59 = vld [vmem:[#allocation2 + $0x390] ss:$40 sps:$4 sm:$0xff]  }
 0x1e8   : > { %1680 = vmatpush1.bf16.msra.mxu1 %v2929_v60  ;;  %1723 = vmatpush1.bf16.msra.mxu0 %v2932_v61  ;;  %v3021_v60 = vld [vmem:[#allocation2 + $0x3e4] ss:$40 sps:$4 sm:$0xff]   ;;  %v3019_v61 = vld [vmem:[#allocation2 + $0x3e0] ss:$40 sps:$4 sm:$0xff]  }
 0x1e9   : > { %1681 = vmatprep.subr.bf16.mxu1 %v2937_v62  ;;  %1724 = vmatprep.subr.bf16.mxu0 %v2940_v63  ;;  %v3024_v62 = vld [vmem:[#allocation2 + $0x434] ss:$40 sps:$4 sm:$0xff]   ;;  %v3022_v63 = vld [vmem:[#allocation2 + $0x430] ss:$40 sps:$4 sm:$0xff]  }
 0x1ec   : > { %1682 = vmatpush1.bf16.msra.mxu1 %v2935_v0  ;;  %1725 = vmatpush1.bf16.msra.mxu0 %v2938_v1  ;;  %v3027_v0 = vld [vmem:[#allocation2 + $0x484] ss:$40 sps:$4 sm:$0xff]   ;;  %v3025_v1 = vld [vmem:[#allocation2 + $0x480] ss:$40 sps:$4 sm:$0xff]  }
 0x1ed   : > { %1683 = vmatprep.subr.bf16.mxu1 %v2943_v2  ;;  %1726 = vmatprep.subr.bf16.mxu0 %v2946_v3  ;;  %v3030_v2 = vld [vmem:[#allocation2 + $0x4d4] ss:$40 sps:$4 sm:$0xff]   ;;  %v3028_v3 = vld [vmem:[#allocation2 + $0x4d0] ss:$40 sps:$4 sm:$0xff]  }
 0x1f0   : > { %1684 = vmatpush1.bf16.msra.mxu1 %v2941_v4  ;;  %1727 = vmatpush1.bf16.msra.mxu0 %v2944_v5 }
 0x1f1   : > { %1685 = vmatprep.subr.bf16.mxu1 %v2949_v6  ;;  %1728 = vmatprep.subr.bf16.mxu0 %v2952_v7 }
 0x1f4   : > { %1686 = vmatpush1.bf16.msra.mxu1 %v2947_v8  ;;  %1729 = vmatpush1.bf16.msra.mxu0 %v2950_v10 }
 0x1f5   : > { %1687 = vmatprep.subr.bf16.mxu1 %v2955_v11  ;;  %1730 = vmatprep.subr.bf16.mxu0 %v2958_v12 }
 0x1f8   : > { %1688 = vmatpush1.bf16.msra.mxu1 %v2953_v13  ;;  %1731 = vmatpush1.bf16.msra.mxu0 %v2956_v14 }
 0x1f9   : > { %1689 = vmatprep.subr.bf16.mxu1 %v2961_v15  ;;  %1732 = vmatprep.subr.bf16.mxu0 %v2964_v16 }
 0x1fc   : > { %1690 = vmatpush1.bf16.msra.mxu1 %v2959_v17  ;;  %1733 = vmatpush1.bf16.msra.mxu0 %v2962_v18 }
 0x1fd   : > { %1691 = vmatprep.subr.bf16.mxu1 %v2967_v19  ;;  %1734 = vmatprep.subr.bf16.mxu0 %v2970_v20 }
 0x200   : > { %1692 = vmatpush1.bf16.msra.mxu1 %v2965_v21  ;;  %1735 = vmatpush1.bf16.msra.mxu0 %v2968_v22 }
 0x201   : > { %1693 = vmatprep.subr.bf16.mxu1 %v2973_v23  ;;  %1736 = vmatprep.subr.bf16.mxu0 %v2976_v24 }
 0x204   : > { %1694 = vmatpush1.bf16.msra.mxu1 %v2971_v25  ;;  %1737 = vmatpush1.bf16.msra.mxu0 %v2974_v32 }
 0x205   : > { %1695 = vmatprep.subr.bf16.mxu1 %v2979_v33  ;;  %1738 = vmatprep.subr.bf16.mxu0 %v2982_v34 }
 0x208   : > { %1696 = vmatpush1.bf16.msra.mxu1 %v2977_v35  ;;  %1739 = vmatpush1.bf16.msra.mxu0 %v2980_v36 }
 0x209   : > { %1751 = vmatprep.subr.bf16.mxu1 %v2985_v37  ;;  %v3031_v37 = vld [vmem:[%s3640_s5] ss:$12 sps:$4 sm:$0xff]  }
 0x20b   : > { %2610 = vmatmul.mubr.msk.bf16.vlgmr.msra.gmra.mrb[4].mxu1 %vm3375_vm6, %v3381_v31  ;;  %2616 = vmatmul.mubr.msk.bf16.vlgmr.msra.gmra.mrb[8].mxu0 %vm3375_vm6, %v3381_v31 }
 0x20c   : > { %1752 = vmatpush1.bf16.msra.mxu1 %v2983_v38  ;;  %2619 = vmatprep.mubr.msk.bf16.mxu1 %vm3375_vm6, %v3379_v30  ;;  %v3001_v30 = vld [vmem:[#allocation2 + $0x200] ss:$40 sps:$4 sm:$0xff]   ;;  %v3033_v38 = vld [vmem:[%s3640_s5 + $0x4] ss:$12 sps:$4 sm:$0xff]  }
 0x20d   : > { %1753 = vmatprep.subr.bf16.mxu1 %v2988_v39  ;;  %v3036_v39 = vld [vmem:[%s3640_s5 + $0x1c] ss:$12 sps:$4 sm:$0xff]   ;;  %2216 = vmatprep.subr.bf16.mxu0 %v3033_v38  ;;  %v1845_v38 = vld [vmem:[%s3639_s4] sm:$0x3] }
 0x20e   : > { %2217 = vmatpush1.bf16.msra.mxu0 %v3031_v37 }
 0x20f   : > { %2218 = vmatprep.subr.bf16.mxu0 %v3036_v39 }
 0x210   : > { %1754 = vmatpush1.bf16.msra.mxu1 %v2986_v40  ;;  %v3034_v40 = vld [vmem:[%s3640_s5 + $0x18] ss:$12 sps:$4 sm:$0xff]  }
 0x211   : > { %1755 = vmatprep.subr.bf16.mxu1 %v2991_v41  ;;  %v3039_v41 = vld [vmem:[%s3640_s5 + $0x34] ss:$12 sps:$4 sm:$0xff]  }
 0x212   : > { %2219 = vmatpush1.bf16.msra.mxu0 %v3034_v40 }
 0x213   : > { %2220 = vmatprep.subr.bf16.mxu0 %v3039_v41 }
 0x214   : > { %1756 = vmatpush1.bf16.msra.mxu1 %v2989_v42  ;;  %v3058_v42 = vld [vmem:[%s3640_s5 + $0xc8] ss:$12 sps:$4 sm:$0xff]  }
 0x215   : > { %1757 = vmatprep.subr.bf16.mxu1 %v2994_v43  ;;  %v3059_v43 = vld [vmem:[%s3640_s5 + $0x8] ss:$12 sps:$4 sm:$0xff]  }
 0x218   : > { %1758 = vmatpush1.bf16.msra.mxu1 %v2992_v44  ;;  %v3037_v44 = vld [vmem:[%s3640_s5 + $0x30] ss:$12 sps:$4 sm:$0xff]  }
 0x219   : > { %1759 = vmatprep.subr.bf16.mxu1 %v2997_v45  ;;  %v3063_v45 = vld [vmem:[%s3640_s5 + $0xe0] ss:$12 sps:$4 sm:$0xff]   ;;  %2221 = vmatpush1.bf16.msra.mxu0 %v3037_v44  ;;  %v1850_v44 = vrot.slane %v1845_v38, %v339_v27  ;;  %v3080_v27 = vld [vmem:[%s3640_s5 + $0x138] ss:$12 sps:$4 sm:$0xff]  }
 0x21c   : > { %1760 = vmatpush1.bf16.msra.mxu1 %v2995_v46  ;;  %v3042_v46 = vld [vmem:[%s3640_s5 + $0x4c] ss:$12 sps:$4 sm:$0xff]  }
 0x21d   : > { %1761 = vmatprep.subr.bf16.mxu1 %v3000_v47  ;;  %v3064_v47 = vld [vmem:[%s3640_s5 + $0x20] ss:$12 sps:$4 sm:$0xff]   ;;  %2222 = vmatprep.subr.bf16.mxu0 %v3042_v46 }
 0x220   : > { %1762 = vmatpush1.bf16.msra.mxu1 %v2998_v48  ;;  %v3068_v48 = vld [vmem:[%s3640_s5 + $0xf8] ss:$12 sps:$4 sm:$0xff]  }
 0x221   : > { %1763 = vmatprep.subr.bf16.mxu1 %v3003_v49  ;;  %v3040_v49 = vld [vmem:[%s3640_s5 + $0x48] ss:$12 sps:$4 sm:$0xff]  }
 0x222   : > { %2223 = vmatpush1.bf16.msra.mxu0 %v3040_v49  ;;  %v1854_v49 = vrot.slane %v1845_v38, %v343_v29 }
 0x224   : > { %1764 = vmatpush1.bf16.msra.mxu1 %v3001_v30  ;;  %v3045_v30 = vld [vmem:[%s3640_s5 + $0x64] ss:$12 sps:$4 sm:$0xff]  }
 0x225   : > { %1765 = vmatprep.subr.bf16.mxu1 %v3006_v50  ;;  %v3069_v50 = vld [vmem:[%s3640_s5 + $0x38] ss:$12 sps:$4 sm:$0xff]   ;;  %2224 = vmatprep.subr.bf16.mxu0 %v3045_v30 }
 0x228   : > { %1766 = vmatpush1.bf16.msra.mxu1 %v3004_v51  ;;  %v3073_v51 = vld [vmem:[%s3640_s5 + $0x110] ss:$12 sps:$4 sm:$0xff]  }
 0x229   : > { %1767 = vmatprep.subr.bf16.mxu1 %v3009_v52  ;;  %v3043_v52 = vld [vmem:[%s3640_s5 + $0x60] ss:$12 sps:$4 sm:$0xff]  }
 0x22a   : > { %2225 = vmatpush1.bf16.msra.mxu0 %v3043_v52 }
 0x22c   : > { %1768 = vmatpush1.bf16.msra.mxu1 %v3007_v53  ;;  %v3048_v53 = vld [vmem:[%s3640_s5 + $0x7c] ss:$12 sps:$4 sm:$0xff]  }
 0x22d   : > { %1769 = vmatprep.subr.bf16.mxu1 %v3012_v54  ;;  %v3074_v54 = vld [vmem:[%s3640_s5 + $0x50] ss:$12 sps:$4 sm:$0xff]   ;;  %2226 = vmatprep.subr.bf16.mxu0 %v3048_v53 }
 0x230   : > { %1770 = vmatpush1.bf16.msra.mxu1 %v3010_v55  ;;  %v3078_v55 = vld [vmem:[%s3640_s5 + $0x128] ss:$12 sps:$4 sm:$0xff]  }
 0x231   : > { %1771 = vmatprep.subr.bf16.mxu1 %v3015_v56  ;;  %v3046_v56 = vld [vmem:[%s3640_s5 + $0x78] ss:$12 sps:$4 sm:$0xff]  }
 0x232   : > { %2227 = vmatpush1.bf16.msra.mxu0 %v3046_v56 }
 0x234   : > { %1772 = vmatpush1.bf16.msra.mxu1 %v3013_v57  ;;  %v3051_v57 = vld [vmem:[%s3640_s5 + $0x94] ss:$12 sps:$4 sm:$0xff]  }
 0x235   : > { %1773 = vmatprep.subr.bf16.mxu1 %v3018_v58  ;;  %v3079_v58 = vld [vmem:[%s3640_s5 + $0x68] ss:$12 sps:$4 sm:$0xff]   ;;  %2228 = vmatprep.subr.bf16.mxu0 %v3051_v57 }
 0x238   : > { %1774 = vmatpush1.bf16.msra.mxu1 %v3016_v59  ;;  %v3049_v59 = vld [vmem:[%s3640_s5 + $0x90] ss:$12 sps:$4 sm:$0xff]  }
 0x239   : > { %1775 = vmatprep.subr.bf16.mxu1 %v3021_v60  ;;  %v3054_v60 = vld [vmem:[%s3640_s5 + $0xac] ss:$12 sps:$4 sm:$0xff]   ;;  %2229 = vmatpush1.bf16.msra.mxu0 %v3049_v59  ;;  %v3087_v59 = vld [vmem:[%s3640_s5 + $0x154] ss:$12 sps:$4 sm:$0xff]  }
 0x23a   : > { %2230 = vmatprep.subr.bf16.mxu0 %v3054_v60  ;;  %v3088_v60 = vld [vmem:[%s3640_s5 + $0x158] ss:$12 sps:$4 sm:$0xff]  }
 0x23c   : > { %1776 = vmatpush1.bf16.msra.mxu1 %v3019_v61  ;;  %v3052_v61 = vld [vmem:[%s3640_s5 + $0xa8] ss:$12 sps:$4 sm:$0xff]  }
 0x23d   : > { %1777 = vmatprep.subr.bf16.mxu1 %v3024_v62  ;;  %v3057_v62 = vld [vmem:[%s3640_s5 + $0xc4] ss:$12 sps:$4 sm:$0xff]   ;;  %2231 = vmatpush1.bf16.msra.mxu0 %v3052_v61 }
 0x23e   : > { %2232 = vmatprep.subr.bf16.mxu0 %v3057_v62 }
 0x240   : > { %1778 = vmatpush1.bf16.msra.mxu1 %v3022_v63  ;;  %v3055_v63 = vld [vmem:[%s3640_s5 + $0xc0] ss:$12 sps:$4 sm:$0xff]  }
 0x241   : > { %1779 = vmatprep.subr.bf16.mxu1 %v3027_v0  ;;  %v3062_v0 = vld [vmem:[%s3640_s5 + $0xdc] ss:$12 sps:$4 sm:$0xff]   ;;  %2233 = vmatpush1.bf16.msra.mxu0 %v3055_v63 }
 0x242   : > { %2234 = vmatprep.subr.bf16.mxu0 %v3062_v0  ;;  %v3085_v63 = vld [vmem:[%s3640_s5 + $0x150] ss:$12 sps:$4 sm:$0xff]   ;;  %v3089_v0 = vld [vmem:[%s3640_s5 + $0x98] ss:$12 sps:$4 sm:$0xff]  }
 0x244   : > { %1780 = vmatpush1.bf16.msra.mxu1 %v3025_v1  ;;  %v3060_v1 = vld [vmem:[%s3640_s5 + $0xd8] ss:$12 sps:$4 sm:$0xff]  }
 0x245   : > { %1781 = vmatprep.subr.bf16.mxu1 %v3030_v2  ;;  %v3067_v2 = vld [vmem:[%s3640_s5 + $0xf4] ss:$12 sps:$4 sm:$0xff]   ;;  %2235 = vmatpush1.bf16.msra.mxu0 %v3060_v1 }
 0x246   : > { %2236 = vmatprep.subr.bf16.mxu0 %v3067_v2 }
 0x248   : > { %1782 = vmatpush1.bf16.msra.mxu1 %v3028_v3  ;;  %v3065_v3 = vld [vmem:[%s3640_s5 + $0xf0] ss:$12 sps:$4 sm:$0xff]  }
 0x249   : > { %2675 = vmatprep.subr.bf16.mxu1 %v3058_v42  ;;  %2237 = vmatpush1.bf16.msra.mxu0 %v3065_v3 }
 0x24b   : > { %2622 = vmatmul.mubr.msk.bf16.vlgmr.msra.gmra.mrb[8].mxu1 %vm3375_vm6, %v3381_v31 }
 0x24c   : > { %2676 = vmatpush3.bf16.msra.mxu1 %v3059_v43 }
 0x24d   : > { %2677 = vmatprep.subr.bf16.mxu1 %v3063_v45 }
 0x250   : > { %2678 = vmatpush3.bf16.msra.mxu1 %v3064_v47  ;;  %v3082_v47 = vld [vmem:[%s3640_s5 + $0x13c] ss:$12 sps:$4 sm:$0xff]  }
 0x251   : > { %2679 = vmatprep.subr.bf16.mxu1 %v3068_v48  ;;  %v3083_v48 = vld [vmem:[%s3640_s5 + $0x140] ss:$12 sps:$4 sm:$0xff]  }
 0x254   : > { %2680 = vmatpush3.bf16.msra.mxu1 %v3069_v50 }
 0x255   : > { %2681 = vmatprep.subr.bf16.mxu1 %v3073_v51  ;;  %v3084_v51 = vld [vmem:[%s3640_s5 + $0x80] ss:$12 sps:$4 sm:$0xff]  }
 0x258   : > { %2682 = vmatpush3.bf16.msra.mxu1 %v3074_v54 }
 0x259   : > { %2683 = vmatprep.subr.bf16.mxu1 %v3078_v55 }
 0x25c   : > { %2684 = vmatpush3.bf16.msra.mxu1 %v3079_v58 }
 0x25d   : > { %2685 = vmatprep.subr.bf16.mxu1 %v3083_v48 }
 0x260   : > { %2686 = vmatpush3.bf16.msra.mxu1 %v3084_v51 }
 0x261   : > { %2687 = vmatprep.subr.bf16.mxu1 %v3088_v60 }
 0x264   : > { %2688 = vmatpush3.bf16.msra.mxu1 %v3089_v0 }
 0x29e   : > { %v1613_v4 = vpop.f32.mrb[0].mxu1  ;;  %v1656_v5 = vpop.f32.mrb[4].mxu0 }
 0x29f   : > { %v1615_v6 = vpop.f32.mrb[1].mxu1  ;;  %v1658_v7 = vpop.f32.mrb[5].mxu0  ;;  %v1794_v11 = vrot.slane %v1613_v4, 4  ;;  %v1803_v12 = vrot.slane %v1656_v5, 6  ;;  %v3072_v4 = vld [vmem:[%s3640_s5 + $0x10c] ss:$12 sps:$4 sm:$0xff]  }
 0x2a0   : > { %v1617_v8 = vpop.f32.mrb[2].mxu1  ;;  %v1660_v10 = vpop.f32.mrb[6].mxu0  ;;  %v1795_v17 = vrot.slane %v1615_v6, 4  ;;  %v1804_v18 = vrot.slane %v1658_v7, 6  ;;  %2238 = vmatprep.subr.bf16.mxu0 %v3072_v4 }
 0x2a1   : > { %v1796_v13 = vrot.slane %v1617_v8, 4  ;;  %v1805_v14 = vrot.slane %v1660_v10, 6  ;;  %v1619_v15 = vpop.f32.mrb[3].mxu1  ;;  %v1662_v16 = vpop.f32.mrb[7].mxu0 }
 0x2a2   : > { %v1797_v28 = vrot.slane %v1619_v15, 4  ;;  %v1806_v31 = vrot.slane %v1662_v16, 6 }
 0x2a3   : > { %v1801_v19 = vsel %vm1798_vm7, %v1796_v13, %v1794_v11  ;;  %v1810_v20 = vsel %vm1807_vm8, %v1805_v14, %v1803_v12  ;;  %v1799_v21 = vsel %vm1798_vm7, %v1794_v11, %v1796_v13  ;;  %v1808_v22 = vsel %vm1807_vm8, %v1803_v12, %v1805_v14  ;;  %v3070_v14 = vld [vmem:[%s3640_s5 + $0x108] ss:$12 sps:$4 sm:$0xff]  }
 0x2a4   : > { %v3423_v23 = vadd.f32 %v1810_v20, %v1801_v19  ;;  %v1802_v24 = vsel %vm1798_vm7, %v1797_v28, %v1795_v17  ;;  %v1811_v25 = vsel %vm1807_vm8, %v1806_v31, %v1804_v18  ;;  %v3429_v32 = vadd.f32 %v1808_v22, %v1799_v21  ;;  %2239 = vmatpush1.bf16.msra.mxu0 %v3070_v14 }
 0x2a5   : > { %v3431_v33 = vadd.f32 %v1811_v25, %v1802_v24  ;;  %v1800_v34 = vsel %vm1798_vm7, %v1795_v17, %v1797_v28  ;;  %v1809_v35 = vsel %vm1807_vm8, %v1804_v18, %v1806_v31  ;;  %v3077_v31 = vld [vmem:[%s3640_s5 + $0x124] ss:$12 sps:$4 sm:$0xff]  }
 0x2a6   : > { %v3437_v36 = vadd.f32 %v1809_v35, %v1800_v34  ;;  %v3075_v34 = vld [vmem:[%s3640_s5 + $0x120] ss:$12 sps:$4 sm:$0xff]   ;;  %2240 = vmatprep.subr.bf16.mxu0 %v3077_v31 }
 0x2a8   : > { %2241 = vmatpush1.bf16.msra.mxu0 %v3075_v34 }
 0x2a9   : > { %2242 = vmatprep.subr.bf16.mxu0 %v3082_v47 }
 0x2ac   : > { %2243 = vmatpush1.bf16.msra.mxu0 %v3080_v27 }
 0x2ad   : > { %2244 = vmatprep.subr.bf16.mxu0 %v3087_v59 }
 0x2b0   : > { %2245 = vmatpush1.bf16.msra.mxu0 %v3085_v63 }
 0x2de   : > { %v1699_v5 = vpop.f32.mrb[4].mxu1  ;;  %v1742_v6 = vpop.f32.mrb[8].mxu0 }
 0x2df   : > { %v1816_v7 = vadd.f32 %v3423_v23, %v1699_v5  ;;  %v1701_v8 = vpop.f32.mrb[5].mxu1  ;;  %v1744_v10 = vpop.f32.mrb[9].mxu0  ;;  %v1820_v15 = vrot.slane %v1742_v6, 2 }
 0x2e0   : > { %v1817_v11 = vadd.f32 %v3431_v33, %v1701_v8  ;;  %v1703_v12 = vpop.f32.mrb[6].mxu1  ;;  %v1746_v13 = vpop.f32.mrb[10].mxu0  ;;  %v1821_v19 = vrot.slane %v1744_v10, 2  ;;  %v3093_v8 = vld [vmem:[%s3640_s5 + $0x170] ss:$12 sps:$4 sm:$0xff]  }
 0x2e1   : > { %v1818_v16 = vadd.f32 %v3429_v32, %v1703_v12  ;;  %v1822_v17 = vrot.slane %v1746_v13, 2  ;;  %v1705_v18 = vpop.f32.mrb[7].mxu1  ;;  %v1748_v28 = vpop.f32.mrb[11].mxu0  ;;  %v3090_v12 = vld [vmem:[%s3640_s5 + $0x168] ss:$12 sps:$4 sm:$0xff]   ;;  %2689 = vmatprep.subr.bf16.mxu1 %v3093_v8 }
 0x2e2   : > { %v1819_v20 = vadd.f32 %v3437_v36, %v1705_v18  ;;  %v1823_v21 = vrot.slane %v1748_v28, 2  ;;  %v3094_v13 = vld [vmem:[%s3640_s5 + $0xb0] ss:$12 sps:$4 sm:$0xff]  }
 0x2e3   : > { %v1825_v22 = vsel %vm1824_vm9, %v1820_v15, %v1822_v17  ;;  %v1827_v23 = vsel %vm1824_vm9, %v1822_v17, %v1820_v15  ;;  %2690 = vmatpush3.bf16.msra.mxu1 %v3094_v13 }
 0x2e4   : > { %v1829_v24 = vadd.f32 %v1825_v22, %v1816_v7  ;;  %v1831_v25 = vadd.f32 %v1827_v23, %v1818_v16  ;;  %v1826_v32 = vsel %vm1824_vm9, %v1821_v19, %v1823_v21  ;;  %v1828_v33 = vsel %vm1824_vm9, %v1823_v21, %v1821_v19  ;;  %v3092_v7 = vld [vmem:[%s3640_s5 + $0x16c] ss:$12 sps:$4 sm:$0xff]  }
 0x2e5   : > { %v1830_v35 = vadd.f32 %v1826_v32, %v1817_v11  ;;  %v1832_v36 = vadd.f32 %v1828_v33, %v1819_v20  ;;  %2246 = vmatprep.subr.bf16.mxu0 %v3092_v7 }
 0x2e6   : > { %2247 = vmatpush1.bf16.msra.mxu0 %v3090_v12 }
 0x31e   : > { %v1785_v37 = vpop.f32.mrb[8].mxu1 }
 0x31f   : > { %v1787_v39 = vpop.f32.mrb[9].mxu1  ;;  %v1833_v41 = vrot.slane %v1785_v37, 4 }
 0x320   : > { %v1789_v40 = vpop.f32.mrb[10].mxu1  ;;  %v1834_v45 = vrot.slane %v1787_v39, 4 }
 0x321   : > { %v1835_v42 = vrot.slane %v1789_v40, 4  ;;  %v1791_v43 = vpop.f32.mrb[11].mxu1 }
 0x322   : > { %v1836_v46 = vrot.slane %v1791_v43, 4 }
 0x323   : > { %v1837_v30 = vsel %vm1798_vm7, %v1833_v41, %v1835_v42  ;;  %v1839_v50 = vsel %vm1798_vm7, %v1835_v42, %v1833_v41 }
 0x324   : > { %v1841_v52 = vadd.f32 %v1837_v30, %v1829_v24  ;;  %v1843_v53 = vadd.f32 %v1839_v50, %v1831_v25  ;;  %v1838_v54 = vsel %vm1798_vm7, %v1834_v45, %v1836_v46  ;;  %v1840_v29 = vsel %vm1798_vm7, %v1836_v46, %v1834_v45 }
 0x325   : > { %v1842_v55 = vadd.f32 %v1838_v54, %v1830_v35  ;;  %v1844_v56 = vadd.f32 %v1840_v29, %v1832_v36 }
 0x326   : > { %v1857_v57 = vadd.f32 %v1850_v44, %v1841_v52  ;;  %v1859_v58 = vadd.f32 %v1850_v44, %v1843_v53 }
 0x327   : > { %v1858_v61 = vadd.f32 %v1854_v49, %v1842_v55  ;;  %v1860_v62 = vadd.f32 %v1854_v49, %v1844_v56  ;;  %v2671_v56 = vld [vmem:[%s3641_s6] ss:$0 sm:$0xff] }
 0x328   : > { %v1861_v1 = vmax.f32 %v1857_v57, 0.0  ;;  %v1863_v2 = vmax.f32 %v1859_v58, 0.0 }
 0x329   : > { %v1862_v3 = vmax.f32 %v1858_v61, 0.0  ;;  %v1864_v4 = vmax.f32 %v1860_v62, 0.0 }
 0x32a   : > { %v1865_v5 = vrot.slane %v1861_v1, 2  ;;  %v1867_v6 = vrot.slane %v1863_v2, 2 }
 0x32b   : > { %v1866_v10 = vrot.slane %v1862_v3, 2  ;;  %v1868_v11 = vrot.slane %v1864_v4, 2 }
 0x32c   : > { %v1869_v14 = vsel %vm1824_vm9, %v1865_v5, %v1867_v6  ;;  %v1871_v15 = vsel %vm1824_vm9, %v1867_v6, %v1865_v5 }
 0x32d   : > { %v1873_v16 = vmax.f32 %v1861_v1, %v1869_v14  ;;  %v1875_v17 = vmax.f32 %v1863_v2, %v1871_v15  ;;  %v1870_v18 = vsel %vm1824_vm9, %v1866_v10, %v1868_v11  ;;  %v1872_v28 = vsel %vm1824_vm9, %v1868_v11, %v1866_v10 }
 0x32e   : > { %v1874_v31 = vmax.f32 %v1862_v3, %v1870_v18  ;;  %v1876_v19 = vmax.f32 %v1864_v4, %v1872_v28 }
 0x32f   : > { %v2730_v20 = vpack.i.bf16 %v1875_v17, %v1873_v16 }
 0x330   : > { %v2735_v21 = vpack.i.bf16 %v1876_v19, %v1874_v31 }
 0x331   : > { %2731 = vrot.lane.b32.xlu1 %v2730_v20, %s3139_s8 }
 0x335   : > { %2736 = vrot.lane.b32.xlu1 %v2735_v21, %s3139_s8 }
 0x3a3   : > { %v2732_v22 = vpop.permute.xlu1 %2731 }
 0x3a4   : > { %v2734_v24 = vunpack.i.h.bf16 %v2732_v22  ;;  %v2733_v25 = vunpack.i.l.bf16 %v2732_v22 }
 0x3a7   : > { %v2737_v23 = vpop.permute.xlu1 %2736 }
 0x3a8   : > { %v2739_v32 = vunpack.i.h.bf16 %v2737_v23  ;;  %v2738_v33 = vunpack.i.l.bf16 %v2737_v23 }
 0x3aa   : > { %v1887_v34 = vsel %vm1885_vm10, %v2734_v24, %v2739_v32  ;;  %v1889_v35 = vsel %vm1885_vm10, %v2739_v32, %v2734_v24  ;;  %v1886_v36 = vsel %vm1885_vm10, %v2733_v25, %v2738_v33  ;;  %v1888_v37 = vsel %vm1885_vm10, %v2738_v33, %v2733_v25 }
 0x3ab   : > { %v1892_v38 = vmax.f32 %v1875_v17, %v1887_v34  ;;  %v1890_v39 = vmax.f32 %v1873_v16, %v1886_v36  ;;  %v1891_v40 = vmax.f32 %v1874_v31, %v1888_v37  ;;  %v1893_v41 = vmax.f32 %v1876_v19, %v1889_v35 }
 0x3ad   : > { %v1895_v42 = vpack.c.bf16 %v1893_v41, %v1891_v40  ;;  %v1894_v43 = vpack.c.bf16 %v1892_v38, %v1890_v39 }
 0x3af   : > { %2248 = vmatprep.mubr.bf16.mxu0 %v1895_v42  ;;  %2291 = vmatprep.mubr.bf16.mxu1 %v1895_v42 }
 0x3b0   : > { %2249 = vmatmul.mubr.bf16.vlgmr.msra.gmra.mrb[12].mxu0 %v1894_v43  ;;  %2292 = vmatmul.mubr.bf16.vlgmr.msra.gmra.mrb[12].mxu1 %v1894_v43 }
 0x483   : > { %v2250_v9 = vpop.f32.mrb[12].mxu0  ;;  %v2691_v44 = vpop.f32.mrb[12].mxu1 }
 0x484   : > { %v2252_v45 = vpop.f32.mrb[13].mxu0  ;;  %v2692_v46 = vpop.f32.mrb[13].mxu1 }
 0x485   : > { %v2693_v47 = vadd.f32 %v2692_v46, %v2691_v44  ;;  %v2254_v48 = vpop.f32.mrb[14].mxu0  ;;  %v2694_v49 = vpop.f32.mrb[14].mxu1  ;;  %v2300_v27 = vrot.slane %v2252_v45, 4 }
 0x486   : > { %v2256_v30 = vpop.f32.mrb[15].mxu0  ;;  %v2695_v50 = vpop.f32.mrb[15].mxu1 }
 0x487   : > { %v2301_v51 = vrot.slane %v2256_v30, 4  ;;  %v2696_v52 = vadd.f32 %v2695_v50, %v2694_v49 }
 0x489   : > { %v2302_v53 = vsel %vm1798_vm7, %v2300_v27, %v2301_v51  ;;  %v2303_v54 = vsel %vm1798_vm7, %v2301_v51, %v2300_v27 }
 0x48a   : > { %v2305_v29 = vadd.f32 %v2303_v54, %v2254_v48  ;;  %v2304_v55 = vadd.f32 %v2302_v53, %v2250_v9 }
 0x48c   : > { %v2307_v57 = vadd.f32 %v2693_v47, %v2305_v29  ;;  %v2306_v58 = vadd.f32 %v2696_v52, %v2304_v55 }
 0x48e   : > { %v2315_v59 = vadd.f32 %v2671_v56, %v2306_v58  ;;  %v2316_v60 = vadd.f32 %v2671_v56, %v2307_v57 }
 0x490   : > { %2317 = vst [vmem:[%s298_s14] sm:$0xff] %v2315_v59  ;;  %2318 = vst [vmem:[%s298_s14 + $0x8] sm:$0xff] %v2316_v60 }
 0x491 PF: > { %s18_s24 = sadd.s32 1, %s3133_s24  }
 0x492   : > { %p15_p3 = scmp.ge.s32.totalorder %s18_s24, 4  }
 0x494   :  { %17 = sbr.rel (!%p15_p3) target bundleno = 1 (0x1), region = 83 }
 0x49b   :  { %2341 = vsyncpa [#allocation3], 1 }
 0x49c   :  { %2343 = vsyncpa [#allocation3 + $0x1], 1 }

</bundles_post_ra>
